<compile_context>
chip_gen: v5e
topology: v5e:2x2
jax: 0.10.0
libtpu: 0.0.40
codegen_flags: <defaults>
</compile_context>

<pallas_src>
import functools

import jax
import jax.numpy as jnp
from jax.experimental import pallas as pl
from jax.experimental.pallas import tpu as pltpu

BN_EPS = 1e-5
_COMPUTE_DTYPE = jnp.bfloat16   # MXU operand dtype (accumulation stays f32)
_IM2COL_MAX_C = 128             # below this, fold the K taps into the contraction
_UNROLL_MAX_BLOCKS = 8          # above this, switch to lax.fori_loop over blocks


def _resnet1d_kernel(x_ref, wp_ref, wb_ref, g_ref, b_ref, out_ref,
                     pad_in_ref, pad_h_ref, *, B, L, Cout, K, n_blocks, unroll):
    pad_l = (K - 1) // 2
    M = B * L
    inv_m = 1.0 / M

    # Zero both padded scratches ONCE; every layer overwrites only the interior
    # [pad_l, pad_l + L) rows, so the 'same'-padding halo stays zero throughout.
    pad_in_ref[...] = jnp.zeros(pad_in_ref.shape, pad_in_ref.dtype)
    pad_h_ref[...] = jnp.zeros(pad_h_ref.shape, pad_h_ref.dtype)

    def conv_bn(h, w, layer, pad_ref, relu, residual=None):
        """h: (B, L, C); w: (K*C, Cout) [im2col] or (K, C, Cout) [K-tap acc]."""
        C = pad_ref.shape[-1]
        # Stage the conv input into the persistent padded scratch (bf16).
        pad_ref[:, pad_l:pad_l + L, :] = h.astype(pad_ref.dtype)

        if w.ndim == 2:
            # Small C: single MXU matmul, contraction = K*C.  The lane-axis
            # concat is staged in f32 (same unaligned-offset lowering path as
            # the previous working kernel) and cast to bf16 right at the MXU.
            hp = pad_ref[...].astype(jnp.float32)            # (B, L+K-1, C)
            cols = [hp[:, k:k + L, :] for k in range(K)]
            xcol = cols[0] if K == 1 else jnp.concatenate(cols, axis=-1)
            xcol = xcol.reshape(M, K * C).astype(_COMPUTE_DTYPE)
            y = jnp.dot(xcol, w, preferred_element_type=jnp.float32)
        else:
            # Large C: accumulate K matmuls over shifted bf16 views; avoids the
            # K*-larger im2col buffer (VMEM footprint, critical on v7x).
            hp = pad_ref[...]                                # bf16
            y = jnp.dot(hp[:, 0:L, :].reshape(M, C), w[0],
                        preferred_element_type=jnp.float32)
            for k in range(1, K):
                y = y + jnp.dot(hp[:, k:k + L, :].reshape(M, C), w[k],
                                preferred_element_type=jnp.float32)

        # BatchNorm1d training-mode batch stats, ONE pass over y (sum & sumsq),
        # biased variance, all in f32.  Clamp var >= 0 for numerical safety.
        s1 = jnp.sum(y, axis=0, keepdims=True)               # (1, Cout)
        s2 = jnp.sum(y * y, axis=0, keepdims=True)           # (1, Cout)
        mean = s1 * inv_m
        var = jnp.maximum(s2 * inv_m - mean * mean, 0.0)
        gam = g_ref[pl.ds(layer, 1), :]                      # (1, Cout)
        bet = b_ref[pl.ds(layer, 1), :]
        scale = gam * jax.lax.rsqrt(var + BN_EPS)            # rsqrt -> EUP slot
        bias = bet - mean * scale
        y = y * scale + bias                                 # one FMA / element
        if residual is not None:
            y = y + residual.reshape(M, Cout)
        if relu:
            y = jnp.maximum(y, 0.0)
        return y.reshape(B, L, Cout)

    # projection: Conv -> BN -> ReLU   (x_ref already channels-last bf16)
    h = conv_bn(x_ref[...], wp_ref[...], 0, pad_in_ref, relu=True)

    # residual blocks: ReLU(x + BN(Conv(ReLU(BN(Conv(x))))))
    def res_block(i, h):
        hh = conv_bn(h, wb_ref[2 * i], 1 + 2 * i, pad_h_ref, relu=True)
        return conv_bn(hh, wb_ref[2 * i + 1], 2 + 2 * i, pad_h_ref, relu=True,
                       residual=h)

    if unroll:
        for i in range(n_blocks):
            h = res_block(i, h)
    else:
        # Large n_blocks: counted loop + dynamic first-axis indexing of the
        # weight / BN-param refs keeps instruction memory & compile time small.
        h = jax.lax.fori_loop(0, n_blocks, res_block, h)

    # Channels-last store: lane axis = Cout (lane-dense for real channel counts).
    out_ref[...] = h.astype(out_ref.dtype)


def resnet1d_forward(params, x):
    """x: (B, Cin, L) float32 -> (B, Cout, L) float32.  Whole net in one pallas_call."""
    B, Cin, L = x.shape
    wp = params['proj_w']                      # (K, Cin, Cout)
    wb = params['block_w']                     # (2*n_blocks, K, Cout, Cout)
    gam, bet = params['gamma'], params['beta']
    K, _, Cout = wp.shape
    n_blocks = wb.shape[0] // 2
    n_layers = 1 + 2 * n_blocks
    Lp = L + K - 1
    M = B * L

    # Kernel-boundary prep (cheap XLA ops, deliberately OUTSIDE the kernel):
    #   channels-last activations, bf16 MXU operands, weights pre-reshaped for
    #   the statically-chosen per-layer conv path.
    x_cl = jnp.transpose(x, (0, 2, 1)).astype(_COMPUTE_DTYPE)          # (B, L, Cin)
    wp_k = wp.reshape(K * Cin, Cout) if Cin < _IM2COL_MAX_C else wp
    wb_k = (wb.reshape(2 * n_blocks, K * Cout, Cout)
            if Cout < _IM2COL_MAX_C else wb)
    wp_k = wp_k.astype(_COMPUTE_DTYPE)
    wb_k = wb_k.astype(_COMPUTE_DTYPE)

    unroll = n_blocks <= _UNROLL_MAX_BLOCKS
    kernel = functools.partial(_resnet1d_kernel, B=B, L=L, Cout=Cout, K=K,
                               n_blocks=n_blocks, unroll=unroll)

    flops = 2 * M * K * Cout * (Cin + 2 * n_blocks * Cout)
    bytes_accessed = (2 * (x_cl.size + wp_k.size + wb_k.size)
                      + 4 * (M * Cout + gam.size + bet.size))

    # Working-set estimate for the scoped-VMEM limit (defaults: 16 MiB v5e,
    # 32 MiB v6e/v7x); capped at 64 MiB so it is valid on every generation.
    resident = (2 * (x_cl.size + wp_k.size + wb_k.size)      # bf16 inputs
                + 4 * (gam.size + bet.size)                  # BN params (f32)
                + 2 * B * Lp * (Cin + Cout)                  # padded scratches
                + 4 * 4 * M * Cout                           # live f32 h/hh/y/out
                + 2 * M * K * max(Cin, Cout))                # im2col operand
    vmem_limit = int(min(64 * 1024 * 1024, max(2 * resident, 16 * 1024 * 1024)))

    vmem = pl.BlockSpec(memory_space=pltpu.MemorySpace.VMEM)
    out_cl = pl.pallas_call(
        kernel,
        out_shape=jax.ShapeDtypeStruct((B, L, Cout), jnp.float32),
        in_specs=[vmem] * 5,
        out_specs=vmem,
        scratch_shapes=(
            pltpu.VMEM((B, Lp, Cin), _COMPUTE_DTYPE),    # padded proj input
            pltpu.VMEM((B, Lp, Cout), _COMPUTE_DTYPE),   # padded block activations
        ),
        compiler_params=pltpu.CompilerParams(vmem_limit_bytes=vmem_limit),
        cost_estimate=pl.CostEstimate(flops=flops,
                                      transcendentals=n_layers * Cout,
                                      bytes_accessed=bytes_accessed),
    )(x_cl, wp_k, wb_k, gam, bet)

    # Back to the torch layout outside the kernel (no in-kernel XLU transposes).
    return jnp.transpose(out_cl, (0, 2, 1))


def init_params(key, in_channel, out_channel, kernel_size, n_blocks):
    """Canonical (K, Cin, Cout) weight layout; w[k, c, co] == torch_weight[co, c, k].

    Same distributions as PyTorch defaults: Conv1d weights ~ U(+-1/sqrt(fan_in)),
    BN gamma=1 / beta=0 (fresh module in train() mode -> batch statistics).
    """
    n_layers = 1 + 2 * n_blocks
    kp, kb = jax.random.split(key)

    def uconv(k, fan_in, shape):
        bound = 1.0 / (fan_in ** 0.5)
        return jax.random.uniform(k, shape, jnp.float32, -bound, bound)

    proj_w = uconv(kp, in_channel * kernel_size,
                   (kernel_size, in_channel, out_channel))
    block_w = uconv(kb, out_channel * kernel_size,
                    (2 * n_blocks, kernel_size, out_channel, out_channel))
    return {
        'proj_w': proj_w,
        'block_w': block_w,
        'gamma': jnp.ones((n_layers, out_channel), jnp.float32),
        'beta': jnp.zeros((n_layers, out_channel), jnp.float32),
    }


def _reference_forward(params, x):
    """Pure-JAX f32 reference with identical semantics (for a sanity check)."""
    B, Cin, L = x.shape
    wp, wb = params['proj_w'], params['block_w']
    gam, bet = params['gamma'], params['beta']
    K = wp.shape[0]
    n_blocks = wb.shape[0] // 2
    pad_l = (K - 1) // 2
    pad_r = (K - 1) - pad_l
    hi = jax.lax.Precision.HIGHEST

    def conv(h, w):   # h: (B, L, C); w: (K, C, Co)
        hp = jnp.pad(h, ((0, 0), (pad_l, pad_r), (0, 0)))
        return sum(jnp.einsum('blc,co->blo', hp[:, k:k + L, :], w[k], precision=hi)
                   for k in range(K))

    def bn(y, g, b):
        mean = jnp.mean(y, axis=(0, 1), keepdims=True)
        var = jnp.mean((y - mean) ** 2, axis=(0, 1), keepdims=True)
        return (y - mean) * (g / jnp.sqrt(var + BN_EPS)) + b

    h = jnp.transpose(x, (0, 2, 1))
    h = jax.nn.relu(bn(conv(h, wp), gam[0], bet[0]))
    for i in range(n_blocks):
        hh = jax.nn.relu(bn(conv(h, wb[2 * i]), gam[1 + 2 * i], bet[1 + 2 * i]))
        h = jax.nn.relu(h + bn(conv(hh, wb[2 * i + 1]), gam[2 + 2 * i], bet[2 + 2 * i]))
    return jnp.transpose(h, (0, 2, 1))


if __name__ == "__main__":
    key = jax.random.PRNGKey(0)
    kx, kp = jax.random.split(key)

    B, Cin, Cout, L, K, n_blocks = 2, 4, 32, 16, 3, 2

    x = jax.random.normal(kx, (B, Cin, L), jnp.float32)
    params = init_params(kp, Cin, Cout, K, n_blocks)

    out = jax.jit(resnet1d_forward)(params, x)
    out = jax.block_until_ready(out)

    assert out.shape == (B, Cout, L), out.shape
    assert out.dtype == jnp.float32
    assert bool(jnp.all(jnp.isfinite(out)))

    # Loose sanity check vs. a pure-JAX f32 reference (kernel matmuls are bf16,
    # typical max-abs error ~1e-2; a layout/padding bug would be O(1)).
    ref = jax.block_until_ready(_reference_forward(params, x))
    err = float(jnp.max(jnp.abs(out - ref)))
    assert err < 0.5, f"max abs error vs reference too large: {err}"

    print("KERNEL_OK")
</pallas_src>

<mosaic_0001>
module attributes {stable_mosaic.version = 11 : i64} {
  func.func @_resnet1d_kernel(%arg0: memref<2x16x4xbf16, #tpu.memory_space<vmem>>, %arg1: memref<12x32xbf16, #tpu.memory_space<vmem>>, %arg2: memref<4x96x32xbf16, #tpu.memory_space<vmem>>, %arg3: memref<5x32xf32, #tpu.memory_space<vmem>>, %arg4: memref<5x32xf32, #tpu.memory_space<vmem>>, %arg5: memref<2x16x32xf32, #tpu.memory_space<vmem>>, %arg6: memref<2x18x4xbf16, #tpu.memory_space<vmem>>, %arg7: memref<2x18x32xbf16, #tpu.memory_space<vmem>>) attributes {dimension_semantics = [], scalar_prefetch = 0 : i64, scratch_operands = 2 : i64, tpu.core_type = #tpu.core_type<tc>} {
    %cst = arith.constant 0.000000e+00 : bf16
    %0 = vector.broadcast %cst : bf16 to vector<2x18x4xbf16>
    %c0 = arith.constant 0 : index
    %c0_0 = arith.constant 0 : index
    %c0_1 = arith.constant 0 : index
    %1 = vector.load %arg6[%c0, %c0_0, %c0_1] : memref<2x18x4xbf16, #tpu.memory_space<vmem>>, vector<2x18x4xbf16>
    tpu.vector_store %arg6[%c0, %c0_0, %c0_1], %0 {strides = array<i32>} : memref<2x18x4xbf16, #tpu.memory_space<vmem>>, vector<2x18x4xbf16>,
    %cst_2 = arith.constant 0.000000e+00 : bf16
    %2 = vector.broadcast %cst_2 : bf16 to vector<2x18x32xbf16>
    %c0_3 = arith.constant 0 : index
    %c0_4 = arith.constant 0 : index
    %c0_5 = arith.constant 0 : index
    %3 = vector.load %arg7[%c0_3, %c0_4, %c0_5] : memref<2x18x32xbf16, #tpu.memory_space<vmem>>, vector<2x18x32xbf16>
    tpu.vector_store %arg7[%c0_3, %c0_4, %c0_5], %2 {strides = array<i32>} : memref<2x18x32xbf16, #tpu.memory_space<vmem>>, vector<2x18x32xbf16>,
    %c0_6 = arith.constant 0 : index
    %c0_7 = arith.constant 0 : index
    %c0_8 = arith.constant 0 : index
    %4 = vector.load %arg0[%c0_6, %c0_7, %c0_8] : memref<2x16x4xbf16, #tpu.memory_space<vmem>>, vector<2x16x4xbf16>
    %c0_9 = arith.constant 0 : index
    %c0_10 = arith.constant 0 : index
    %5 = vector.load %arg1[%c0_9, %c0_10] : memref<12x32xbf16, #tpu.memory_space<vmem>>, vector<12x32xbf16>
    %c0_11 = arith.constant 0 : index
    %c1 = arith.constant 1 : index
    %c0_12 = arith.constant 0 : index
    %6 = vector.load %arg6[%c0_11, %c1, %c0_12] : memref<2x18x4xbf16, #tpu.memory_space<vmem>>, vector<2x16x4xbf16>
    tpu.vector_store %arg6[%c0_11, %c1, %c0_12], %4 {strides = array<i32>} : memref<2x18x4xbf16, #tpu.memory_space<vmem>>, vector<2x16x4xbf16>,
    %c0_13 = arith.constant 0 : index
    %c0_14 = arith.constant 0 : index
    %c0_15 = arith.constant 0 : index
    %7 = vector.load %arg6[%c0_13, %c0_14, %c0_15] : memref<2x18x4xbf16, #tpu.memory_space<vmem>>, vector<2x18x4xbf16>
    %8 = arith.extf %7 : vector<2x18x4xbf16> to vector<2x18x4xf32>
    %9 = vector.extract_strided_slice %8 {offsets = [0, 0, 0], sizes = [2, 16, 4], strides = [1, 1, 1]} : vector<2x18x4xf32> to vector<2x16x4xf32>
    %10 = vector.extract_strided_slice %8 {offsets = [0, 1, 0], sizes = [2, 16, 4], strides = [1, 1, 1]} : vector<2x18x4xf32> to vector<2x16x4xf32>
    %11 = vector.extract_strided_slice %8 {offsets = [0, 2, 0], sizes = [2, 16, 4], strides = [1, 1, 1]} : vector<2x18x4xf32> to vector<2x16x4xf32>
    %12 = tpu.concatenate %9, %10, %11 in 2 : vector<2x16x4xf32>, vector<2x16x4xf32>, vector<2x16x4xf32> -> vector<2x16x12xf32>
    %13 = vector.shape_cast %12 : vector<2x16x12xf32> to vector<32x12xf32>
    %14 = arith.truncf %13 : vector<32x12xf32> to vector<32x12xbf16>
    %cst_16 = arith.constant dense<0.000000e+00> : vector<32x32xf32>
    %15 = tpu.matmul %14, %5, %cst_16 {dimension_numbers = #tpu.dot_dimension_numbers<[1], [0], [0], [1], [0, 0, 1, 1], [], []>} : vector<32x12xbf16>, vector<12x32xbf16>, vector<32x32xf32> -> vector<32x32xf32>
    %cst_17 = arith.constant dense<0.000000e+00> : vector<32xf32>
    %16 = vector.multi_reduction <add>, %15, %cst_17 [0] : vector<32x32xf32> to vector<32xf32>
    %17 = vector.shape_cast %16 : vector<32xf32> to vector<1x32xf32>
    %18 = arith.mulf %15, %15 : vector<32x32xf32>
    %cst_18 = arith.constant dense<0.000000e+00> : vector<32xf32>
    %19 = vector.multi_reduction <add>, %18, %cst_18 [0] : vector<32x32xf32> to vector<32xf32>
    %20 = vector.shape_cast %19 : vector<32xf32> to vector<1x32xf32>
    %cst_19 = arith.constant 3.125000e-02 : f32
    %21 = vector.broadcast %cst_19 : f32 to vector<1x32xf32>
    %22 = arith.mulf %17, %21 : vector<1x32xf32>
    %cst_20 = arith.constant 3.125000e-02 : f32
    %23 = vector.broadcast %cst_20 : f32 to vector<1x32xf32>
    %24 = arith.mulf %20, %23 : vector<1x32xf32>
    %25 = arith.mulf %22, %22 : vector<1x32xf32>
    %26 = arith.subf %24, %25 : vector<1x32xf32>
    %cst_21 = arith.constant 0.000000e+00 : f32
    %27 = vector.broadcast %cst_21 : f32 to vector<1x32xf32>
    %28 = arith.maximumf %26, %27 : vector<1x32xf32>
    %c0_22 = arith.constant 0 : index
    %c0_23 = arith.constant 0 : index
    %29 = vector.load %arg3[%c0_22, %c0_23] : memref<5x32xf32, #tpu.memory_space<vmem>>, vector<1x32xf32>
    %c0_24 = arith.constant 0 : index
    %c0_25 = arith.constant 0 : index
    %30 = vector.load %arg4[%c0_24, %c0_25] : memref<5x32xf32, #tpu.memory_space<vmem>>, vector<1x32xf32>
    %cst_26 = arith.constant 9.99999974E-6 : f32
    %31 = vector.broadcast %cst_26 : f32 to vector<1x32xf32>
    %32 = arith.addf %28, %31 : vector<1x32xf32>
    %33 = math.rsqrt %32 : vector<1x32xf32>
    %34 = arith.mulf %29, %33 : vector<1x32xf32>
    %35 = arith.mulf %22, %34 : vector<1x32xf32>
    %36 = arith.subf %30, %35 : vector<1x32xf32>
    %37 = vector.broadcast %34 : vector<1x32xf32> to vector<32x32xf32>
    %38 = arith.mulf %15, %37 : vector<32x32xf32>
    %39 = vector.broadcast %36 : vector<1x32xf32> to vector<32x32xf32>
    %40 = arith.addf %38, %39 : vector<32x32xf32>
    %cst_27 = arith.constant 0.000000e+00 : f32
    %41 = vector.broadcast %cst_27 : f32 to vector<32x32xf32>
    %42 = arith.maximumf %40, %41 : vector<32x32xf32>
    %43 = vector.shape_cast %42 : vector<32x32xf32> to vector<2x16x32xf32>
    %c0_28 = arith.constant 0 : index
    %c0_29 = arith.constant 0 : index
    %c0_30 = arith.constant 0 : index
    %44 = vector.load %arg2[%c0_28, %c0_29, %c0_30] : memref<4x96x32xbf16, #tpu.memory_space<vmem>>, vector<1x96x32xbf16>
    %45 = vector.shape_cast %44 : vector<1x96x32xbf16> to vector<96x32xbf16>
    %46 = arith.truncf %43 : vector<2x16x32xf32> to vector<2x16x32xbf16>
    %c0_31 = arith.constant 0 : index
    %c1_32 = arith.constant 1 : index
    %c0_33 = arith.constant 0 : index
    %47 = vector.load %arg7[%c0_31, %c1_32, %c0_33] : memref<2x18x32xbf16, #tpu.memory_space<vmem>>, vector<2x16x32xbf16>
    tpu.vector_store %arg7[%c0_31, %c1_32, %c0_33], %46 {strides = array<i32>} : memref<2x18x32xbf16, #tpu.memory_space<vmem>>, vector<2x16x32xbf16>,
    %c0_34 = arith.constant 0 : index
    %c0_35 = arith.constant 0 : index
    %c0_36 = arith.constant 0 : index
    %48 = vector.load %arg7[%c0_34, %c0_35, %c0_36] : memref<2x18x32xbf16, #tpu.memory_space<vmem>>, vector<2x18x32xbf16>
    %49 = arith.extf %48 : vector<2x18x32xbf16> to vector<2x18x32xf32>
    %50 = vector.extract_strided_slice %49 {offsets = [0, 0, 0], sizes = [2, 16, 32], strides = [1, 1, 1]} : vector<2x18x32xf32> to vector<2x16x32xf32>
    %51 = vector.extract_strided_slice %49 {offsets = [0, 1, 0], sizes = [2, 16, 32], strides = [1, 1, 1]} : vector<2x18x32xf32> to vector<2x16x32xf32>
    %52 = vector.extract_strided_slice %49 {offsets = [0, 2, 0], sizes = [2, 16, 32], strides = [1, 1, 1]} : vector<2x18x32xf32> to vector<2x16x32xf32>
    %53 = tpu.concatenate %50, %51, %52 in 2 : vector<2x16x32xf32>, vector<2x16x32xf32>, vector<2x16x32xf32> -> vector<2x16x96xf32>
    %54 = vector.shape_cast %53 : vector<2x16x96xf32> to vector<32x96xf32>
    %55 = arith.truncf %54 : vector<32x96xf32> to vector<32x96xbf16>
    %cst_37 = arith.constant dense<0.000000e+00> : vector<32x32xf32>
    %56 = tpu.matmul %55, %45, %cst_37 {dimension_numbers = #tpu.dot_dimension_numbers<[1], [0], [0], [1], [0, 0, 1, 1], [], []>} : vector<32x96xbf16>, vector<96x32xbf16>, vector<32x32xf32> -> vector<32x32xf32>
    %cst_38 = arith.constant dense<0.000000e+00> : vector<32xf32>
    %57 = vector.multi_reduction <add>, %56, %cst_38 [0] : vector<32x32xf32> to vector<32xf32>
    %58 = vector.shape_cast %57 : vector<32xf32> to vector<1x32xf32>
    %59 = arith.mulf %56, %56 : vector<32x32xf32>
    %cst_39 = arith.constant dense<0.000000e+00> : vector<32xf32>
    %60 = vector.multi_reduction <add>, %59, %cst_39 [0] : vector<32x32xf32> to vector<32xf32>
    %61 = vector.shape_cast %60 : vector<32xf32> to vector<1x32xf32>
    %cst_40 = arith.constant 3.125000e-02 : f32
    %62 = vector.broadcast %cst_40 : f32 to vector<1x32xf32>
    %63 = arith.mulf %58, %62 : vector<1x32xf32>
    %cst_41 = arith.constant 3.125000e-02 : f32
    %64 = vector.broadcast %cst_41 : f32 to vector<1x32xf32>
    %65 = arith.mulf %61, %64 : vector<1x32xf32>
    %66 = arith.mulf %63, %63 : vector<1x32xf32>
    %67 = arith.subf %65, %66 : vector<1x32xf32>
    %cst_42 = arith.constant 0.000000e+00 : f32
    %68 = vector.broadcast %cst_42 : f32 to vector<1x32xf32>
    %69 = arith.maximumf %67, %68 : vector<1x32xf32>
    %c1_43 = arith.constant 1 : index
    %c0_44 = arith.constant 0 : index
    %70 = vector.load %arg3[%c1_43, %c0_44] : memref<5x32xf32, #tpu.memory_space<vmem>>, vector<1x32xf32>
    %c1_45 = arith.constant 1 : index
    %c0_46 = arith.constant 0 : index
    %71 = vector.load %arg4[%c1_45, %c0_46] : memref<5x32xf32, #tpu.memory_space<vmem>>, vector<1x32xf32>
    %cst_47 = arith.constant 9.99999974E-6 : f32
    %72 = vector.broadcast %cst_47 : f32 to vector<1x32xf32>
    %73 = arith.addf %69, %72 : vector<1x32xf32>
    %74 = math.rsqrt %73 : vector<1x32xf32>
    %75 = arith.mulf %70, %74 : vector<1x32xf32>
    %76 = arith.mulf %63, %75 : vector<1x32xf32>
    %77 = arith.subf %71, %76 : vector<1x32xf32>
    %78 = vector.broadcast %75 : vector<1x32xf32> to vector<32x32xf32>
    %79 = arith.mulf %56, %78 : vector<32x32xf32>
    %80 = vector.broadcast %77 : vector<1x32xf32> to vector<32x32xf32>
    %81 = arith.addf %79, %80 : vector<32x32xf32>
    %cst_48 = arith.constant 0.000000e+00 : f32
    %82 = vector.broadcast %cst_48 : f32 to vector<32x32xf32>
    %83 = arith.maximumf %81, %82 : vector<32x32xf32>
    %84 = vector.shape_cast %83 : vector<32x32xf32> to vector<2x16x32xf32>
    %c1_49 = arith.constant 1 : index
    %c0_50 = arith.constant 0 : index
    %c0_51 = arith.constant 0 : index
    %85 = vector.load %arg2[%c1_49, %c0_50, %c0_51] : memref<4x96x32xbf16, #tpu.memory_space<vmem>>, vector<1x96x32xbf16>
    %86 = vector.shape_cast %85 : vector<1x96x32xbf16> to vector<96x32xbf16>
    %87 = arith.truncf %84 : vector<2x16x32xf32> to vector<2x16x32xbf16>
    %c0_52 = arith.constant 0 : index
    %c1_53 = arith.constant 1 : index
    %c0_54 = arith.constant 0 : index
    %88 = vector.load %arg7[%c0_52, %c1_53, %c0_54] : memref<2x18x32xbf16, #tpu.memory_space<vmem>>, vector<2x16x32xbf16>
    tpu.vector_store %arg7[%c0_52, %c1_53, %c0_54], %87 {strides = array<i32>} : memref<2x18x32xbf16, #tpu.memory_space<vmem>>, vector<2x16x32xbf16>,
    %c0_55 = arith.constant 0 : index
    %c0_56 = arith.constant 0 : index
    %c0_57 = arith.constant 0 : index
    %89 = vector.load %arg7[%c0_55, %c0_56, %c0_57] : memref<2x18x32xbf16, #tpu.memory_space<vmem>>, vector<2x18x32xbf16>
    %90 = arith.extf %89 : vector<2x18x32xbf16> to vector<2x18x32xf32>
    %91 = vector.extract_strided_slice %90 {offsets = [0, 0, 0], sizes = [2, 16, 32], strides = [1, 1, 1]} : vector<2x18x32xf32> to vector<2x16x32xf32>
    %92 = vector.extract_strided_slice %90 {offsets = [0, 1, 0], sizes = [2, 16, 32], strides = [1, 1, 1]} : vector<2x18x32xf32> to vector<2x16x32xf32>
    %93 = vector.extract_strided_slice %90 {offsets = [0, 2, 0], sizes = [2, 16, 32], strides = [1, 1, 1]} : vector<2x18x32xf32> to vector<2x16x32xf32>
    %94 = tpu.concatenate %91, %92, %93 in 2 : vector<2x16x32xf32>, vector<2x16x32xf32>, vector<2x16x32xf32> -> vector<2x16x96xf32>
    %95 = vector.shape_cast %94 : vector<2x16x96xf32> to vector<32x96xf32>
    %96 = arith.truncf %95 : vector<32x96xf32> to vector<32x96xbf16>
    %cst_58 = arith.constant dense<0.000000e+00> : vector<32x32xf32>
    %97 = tpu.matmul %96, %86, %cst_58 {dimension_numbers = #tpu.dot_dimension_numbers<[1], [0], [0], [1], [0, 0, 1, 1], [], []>} : vector<32x96xbf16>, vector<96x32xbf16>, vector<32x32xf32> -> vector<32x32xf32>
    %cst_59 = arith.constant dense<0.000000e+00> : vector<32xf32>
    %98 = vector.multi_reduction <add>, %97, %cst_59 [0] : vector<32x32xf32> to vector<32xf32>
    %99 = vector.shape_cast %98 : vector<32xf32> to vector<1x32xf32>
    %100 = arith.mulf %97, %97 : vector<32x32xf32>
    %cst_60 = arith.constant dense<0.000000e+00> : vector<32xf32>
    %101 = vector.multi_reduction <add>, %100, %cst_60 [0] : vector<32x32xf32> to vector<32xf32>
    %102 = vector.shape_cast %101 : vector<32xf32> to vector<1x32xf32>
    %cst_61 = arith.constant 3.125000e-02 : f32
    %103 = vector.broadcast %cst_61 : f32 to vector<1x32xf32>
    %104 = arith.mulf %99, %103 : vector<1x32xf32>
    %cst_62 = arith.constant 3.125000e-02 : f32
    %105 = vector.broadcast %cst_62 : f32 to vector<1x32xf32>
    %106 = arith.mulf %102, %105 : vector<1x32xf32>
    %107 = arith.mulf %104, %104 : vector<1x32xf32>
    %108 = arith.subf %106, %107 : vector<1x32xf32>
    %cst_63 = arith.constant 0.000000e+00 : f32
    %109 = vector.broadcast %cst_63 : f32 to vector<1x32xf32>
    %110 = arith.maximumf %108, %109 : vector<1x32xf32>
    %c2 = arith.constant 2 : index
    %c0_64 = arith.constant 0 : index
    %111 = vector.load %arg3[%c2, %c0_64] : memref<5x32xf32, #tpu.memory_space<vmem>>, vector<1x32xf32>
    %c2_65 = arith.constant 2 : index
    %c0_66 = arith.constant 0 : index
    %112 = vector.load %arg4[%c2_65, %c0_66] : memref<5x32xf32, #tpu.memory_space<vmem>>, vector<1x32xf32>
    %cst_67 = arith.constant 9.99999974E-6 : f32
    %113 = vector.broadcast %cst_67 : f32 to vector<1x32xf32>
    %114 = arith.addf %110, %113 : vector<1x32xf32>
    %115 = math.rsqrt %114 : vector<1x32xf32>
    %116 = arith.mulf %111, %115 : vector<1x32xf32>
    %117 = arith.mulf %104, %116 : vector<1x32xf32>
    %118 = arith.subf %112, %117 : vector<1x32xf32>
    %119 = vector.broadcast %116 : vector<1x32xf32> to vector<32x32xf32>
    %120 = arith.mulf %97, %119 : vector<32x32xf32>
    %121 = vector.broadcast %118 : vector<1x32xf32> to vector<32x32xf32>
    %122 = arith.addf %120, %121 : vector<32x32xf32>
    %123 = vector.shape_cast %43 : vector<2x16x32xf32> to vector<32x32xf32>
    %124 = arith.addf %122, %123 : vector<32x32xf32>
    %cst_68 = arith.constant 0.000000e+00 : f32
    %125 = vector.broadcast %cst_68 : f32 to vector<32x32xf32>
    %126 = arith.maximumf %124, %125 : vector<32x32xf32>
    %127 = vector.shape_cast %126 : vector<32x32xf32> to vector<2x16x32xf32>
    %c2_69 = arith.constant 2 : index
    %c0_70 = arith.constant 0 : index
    %c0_71 = arith.constant 0 : index
    %128 = vector.load %arg2[%c2_69, %c0_70, %c0_71] : memref<4x96x32xbf16, #tpu.memory_space<vmem>>, vector<1x96x32xbf16>
    %129 = vector.shape_cast %128 : vector<1x96x32xbf16> to vector<96x32xbf16>
    %130 = arith.truncf %127 : vector<2x16x32xf32> to vector<2x16x32xbf16>
    %c0_72 = arith.constant 0 : index
    %c1_73 = arith.constant 1 : index
    %c0_74 = arith.constant 0 : index
    %131 = vector.load %arg7[%c0_72, %c1_73, %c0_74] : memref<2x18x32xbf16, #tpu.memory_space<vmem>>, vector<2x16x32xbf16>
    tpu.vector_store %arg7[%c0_72, %c1_73, %c0_74], %130 {strides = array<i32>} : memref<2x18x32xbf16, #tpu.memory_space<vmem>>, vector<2x16x32xbf16>,
    %c0_75 = arith.constant 0 : index
    %c0_76 = arith.constant 0 : index
    %c0_77 = arith.constant 0 : index
    %132 = vector.load %arg7[%c0_75, %c0_76, %c0_77] : memref<2x18x32xbf16, #tpu.memory_space<vmem>>, vector<2x18x32xbf16>
    %133 = arith.extf %132 : vector<2x18x32xbf16> to vector<2x18x32xf32>
    %134 = vector.extract_strided_slice %133 {offsets = [0, 0, 0], sizes = [2, 16, 32], strides = [1, 1, 1]} : vector<2x18x32xf32> to vector<2x16x32xf32>
    %135 = vector.extract_strided_slice %133 {offsets = [0, 1, 0], sizes = [2, 16, 32], strides = [1, 1, 1]} : vector<2x18x32xf32> to vector<2x16x32xf32>
    %136 = vector.extract_strided_slice %133 {offsets = [0, 2, 0], sizes = [2, 16, 32], strides = [1, 1, 1]} : vector<2x18x32xf32> to vector<2x16x32xf32>
    %137 = tpu.concatenate %134, %135, %136 in 2 : vector<2x16x32xf32>, vector<2x16x32xf32>, vector<2x16x32xf32> -> vector<2x16x96xf32>
    %138 = vector.shape_cast %137 : vector<2x16x96xf32> to vector<32x96xf32>
    %139 = arith.truncf %138 : vector<32x96xf32> to vector<32x96xbf16>
    %cst_78 = arith.constant dense<0.000000e+00> : vector<32x32xf32>
    %140 = tpu.matmul %139, %129, %cst_78 {dimension_numbers = #tpu.dot_dimension_numbers<[1], [0], [0], [1], [0, 0, 1, 1], [], []>} : vector<32x96xbf16>, vector<96x32xbf16>, vector<32x32xf32> -> vector<32x32xf32>
    %cst_79 = arith.constant dense<0.000000e+00> : vector<32xf32>
    %141 = vector.multi_reduction <add>, %140, %cst_79 [0] : vector<32x32xf32> to vector<32xf32>
    %142 = vector.shape_cast %141 : vector<32xf32> to vector<1x32xf32>
    %143 = arith.mulf %140, %140 : vector<32x32xf32>
    %cst_80 = arith.constant dense<0.000000e+00> : vector<32xf32>
    %144 = vector.multi_reduction <add>, %143, %cst_80 [0] : vector<32x32xf32> to vector<32xf32>
    %145 = vector.shape_cast %144 : vector<32xf32> to vector<1x32xf32>
    %cst_81 = arith.constant 3.125000e-02 : f32
    %146 = vector.broadcast %cst_81 : f32 to vector<1x32xf32>
    %147 = arith.mulf %142, %146 : vector<1x32xf32>
    %cst_82 = arith.constant 3.125000e-02 : f32
    %148 = vector.broadcast %cst_82 : f32 to vector<1x32xf32>
    %149 = arith.mulf %145, %148 : vector<1x32xf32>
    %150 = arith.mulf %147, %147 : vector<1x32xf32>
    %151 = arith.subf %149, %150 : vector<1x32xf32>
    %cst_83 = arith.constant 0.000000e+00 : f32
    %152 = vector.broadcast %cst_83 : f32 to vector<1x32xf32>
    %153 = arith.maximumf %151, %152 : vector<1x32xf32>
    %c3 = arith.constant 3 : index
    %c0_84 = arith.constant 0 : index
    %154 = vector.load %arg3[%c3, %c0_84] : memref<5x32xf32, #tpu.memory_space<vmem>>, vector<1x32xf32>
    %c3_85 = arith.constant 3 : index
    %c0_86 = arith.constant 0 : index
    %155 = vector.load %arg4[%c3_85, %c0_86] : memref<5x32xf32, #tpu.memory_space<vmem>>, vector<1x32xf32>
    %cst_87 = arith.constant 9.99999974E-6 : f32
    %156 = vector.broadcast %cst_87 : f32 to vector<1x32xf32>
    %157 = arith.addf %153, %156 : vector<1x32xf32>
    %158 = math.rsqrt %157 : vector<1x32xf32>
    %159 = arith.mulf %154, %158 : vector<1x32xf32>
    %160 = arith.mulf %147, %159 : vector<1x32xf32>
    %161 = arith.subf %155, %160 : vector<1x32xf32>
    %162 = vector.broadcast %159 : vector<1x32xf32> to vector<32x32xf32>
    %163 = arith.mulf %140, %162 : vector<32x32xf32>
    %164 = vector.broadcast %161 : vector<1x32xf32> to vector<32x32xf32>
    %165 = arith.addf %163, %164 : vector<32x32xf32>
    %cst_88 = arith.constant 0.000000e+00 : f32
    %166 = vector.broadcast %cst_88 : f32 to vector<32x32xf32>
    %167 = arith.maximumf %165, %166 : vector<32x32xf32>
    %168 = vector.shape_cast %167 : vector<32x32xf32> to vector<2x16x32xf32>
    %c3_89 = arith.constant 3 : index
    %c0_90 = arith.constant 0 : index
    %c0_91 = arith.constant 0 : index
    %169 = vector.load %arg2[%c3_89, %c0_90, %c0_91] : memref<4x96x32xbf16, #tpu.memory_space<vmem>>, vector<1x96x32xbf16>
    %170 = vector.shape_cast %169 : vector<1x96x32xbf16> to vector<96x32xbf16>
    %171 = arith.truncf %168 : vector<2x16x32xf32> to vector<2x16x32xbf16>
    %c0_92 = arith.constant 0 : index
    %c1_93 = arith.constant 1 : index
    %c0_94 = arith.constant 0 : index
    %172 = vector.load %arg7[%c0_92, %c1_93, %c0_94] : memref<2x18x32xbf16, #tpu.memory_space<vmem>>, vector<2x16x32xbf16>
    tpu.vector_store %arg7[%c0_92, %c1_93, %c0_94], %171 {strides = array<i32>} : memref<2x18x32xbf16, #tpu.memory_space<vmem>>, vector<2x16x32xbf16>,
    %c0_95 = arith.constant 0 : index
    %c0_96 = arith.constant 0 : index
    %c0_97 = arith.constant 0 : index
    %173 = vector.load %arg7[%c0_95, %c0_96, %c0_97] : memref<2x18x32xbf16, #tpu.memory_space<vmem>>, vector<2x18x32xbf16>
    %174 = arith.extf %173 : vector<2x18x32xbf16> to vector<2x18x32xf32>
    %175 = vector.extract_strided_slice %174 {offsets = [0, 0, 0], sizes = [2, 16, 32], strides = [1, 1, 1]} : vector<2x18x32xf32> to vector<2x16x32xf32>
    %176 = vector.extract_strided_slice %174 {offsets = [0, 1, 0], sizes = [2, 16, 32], strides = [1, 1, 1]} : vector<2x18x32xf32> to vector<2x16x32xf32>
    %177 = vector.extract_strided_slice %174 {offsets = [0, 2, 0], sizes = [2, 16, 32], strides = [1, 1, 1]} : vector<2x18x32xf32> to vector<2x16x32xf32>
    %178 = tpu.concatenate %175, %176, %177 in 2 : vector<2x16x32xf32>, vector<2x16x32xf32>, vector<2x16x32xf32> -> vector<2x16x96xf32>
    %179 = vector.shape_cast %178 : vector<2x16x96xf32> to vector<32x96xf32>
    %180 = arith.truncf %179 : vector<32x96xf32> to vector<32x96xbf16>
    %cst_98 = arith.constant dense<0.000000e+00> : vector<32x32xf32>
    %181 = tpu.matmul %180, %170, %cst_98 {dimension_numbers = #tpu.dot_dimension_numbers<[1], [0], [0], [1], [0, 0, 1, 1], [], []>} : vector<32x96xbf16>, vector<96x32xbf16>, vector<32x32xf32> -> vector<32x32xf32>
    %cst_99 = arith.constant dense<0.000000e+00> : vector<32xf32>
    %182 = vector.multi_reduction <add>, %181, %cst_99 [0] : vector<32x32xf32> to vector<32xf32>
    %183 = vector.shape_cast %182 : vector<32xf32> to vector<1x32xf32>
    %184 = arith.mulf %181, %181 : vector<32x32xf32>
    %cst_100 = arith.constant dense<0.000000e+00> : vector<32xf32>
    %185 = vector.multi_reduction <add>, %184, %cst_100 [0] : vector<32x32xf32> to vector<32xf32>
    %186 = vector.shape_cast %185 : vector<32xf32> to vector<1x32xf32>
    %cst_101 = arith.constant 3.125000e-02 : f32
    %187 = vector.broadcast %cst_101 : f32 to vector<1x32xf32>
    %188 = arith.mulf %183, %187 : vector<1x32xf32>
    %cst_102 = arith.constant 3.125000e-02 : f32
    %189 = vector.broadcast %cst_102 : f32 to vector<1x32xf32>
    %190 = arith.mulf %186, %189 : vector<1x32xf32>
    %191 = arith.mulf %188, %188 : vector<1x32xf32>
    %192 = arith.subf %190, %191 : vector<1x32xf32>
    %cst_103 = arith.constant 0.000000e+00 : f32
    %193 = vector.broadcast %cst_103 : f32 to vector<1x32xf32>
    %194 = arith.maximumf %192, %193 : vector<1x32xf32>
    %c4 = arith.constant 4 : index
    %c0_104 = arith.constant 0 : index
    %195 = vector.load %arg3[%c4, %c0_104] : memref<5x32xf32, #tpu.memory_space<vmem>>, vector<1x32xf32>
    %c4_105 = arith.constant 4 : index
    %c0_106 = arith.constant 0 : index
    %196 = vector.load %arg4[%c4_105, %c0_106] : memref<5x32xf32, #tpu.memory_space<vmem>>, vector<1x32xf32>
    %cst_107 = arith.constant 9.99999974E-6 : f32
    %197 = vector.broadcast %cst_107 : f32 to vector<1x32xf32>
    %198 = arith.addf %194, %197 : vector<1x32xf32>
    %199 = math.rsqrt %198 : vector<1x32xf32>
    %200 = arith.mulf %195, %199 : vector<1x32xf32>
    %201 = arith.mulf %188, %200 : vector<1x32xf32>
    %202 = arith.subf %196, %201 : vector<1x32xf32>
    %203 = vector.broadcast %200 : vector<1x32xf32> to vector<32x32xf32>
    %204 = arith.mulf %181, %203 : vector<32x32xf32>
    %205 = vector.broadcast %202 : vector<1x32xf32> to vector<32x32xf32>
    %206 = arith.addf %204, %205 : vector<32x32xf32>
    %207 = vector.shape_cast %127 : vector<2x16x32xf32> to vector<32x32xf32>
    %208 = arith.addf %206, %207 : vector<32x32xf32>
    %cst_108 = arith.constant 0.000000e+00 : f32
    %209 = vector.broadcast %cst_108 : f32 to vector<32x32xf32>
    %210 = arith.maximumf %208, %209 : vector<32x32xf32>
    %211 = vector.shape_cast %210 : vector<32x32xf32> to vector<2x16x32xf32>
    %c0_109 = arith.constant 0 : index
    %c0_110 = arith.constant 0 : index
    %c0_111 = arith.constant 0 : index
    %212 = vector.load %arg5[%c0_109, %c0_110, %c0_111] : memref<2x16x32xf32, #tpu.memory_space<vmem>>, vector<2x16x32xf32>
    tpu.vector_store %arg5[%c0_109, %c0_110, %c0_111], %211 {strides = array<i32>} : memref<2x16x32xf32, #tpu.memory_space<vmem>>, vector<2x16x32xf32>,
    return
  }
}

</mosaic_0001>

<bundles_post_ra>
// kernel: resnet1d_forward.1
= control target key start
LH: loop header
LB: loop body
LE: loop exit
PB: predicated region body
PF: predicated region fallthrough
CT: control target
= control target key end

     0   :  { %vm22_vm0 = vcmask 27648   ;;  %vm25_vm1 = vcmask 24576   ;;  %v1712_v1 = vmov 0   ;;  %vm44_vm2 = vsmask.f32 256  ;;  %s2204_s0 = inlined_call_operand.vmem [shape: bf16[2,16,4], index: 0, kind: input, shape index: {}]   ;;  %s2205_s1 = inlined_call_operand.vmem [shape: bf16[12,32], index: 1, kind: input, shape index: {}]   ;;  %s2206_s2 = inlined_call_operand.vmem [shape: bf16[4,96,32], index: 2, kind: input, shape index: {}]   ;;  %s2207_s3 = inlined_call_operand.vmem [shape: f32[5,32], index: 3, kind: input, shape index: {}]   ;;  %s2208_s4 = inlined_call_operand.vmem [shape: f32[5,32], index: 4, kind: input, shape index: {}]   ;;  %s2209_s5 = inlined_call_operand.hbm [shape: f32[2,16,32], index: 5, kind: output, shape index: {}]  }
   0x1   :  { %v38_v0 = vld [vmem:[%s2204_s0] sm:$0xf]  ;;  %23 = vst.msk [vmem:[#allocation2] sm:$0xf] %vm22_vm0, %v1712_v1  ;;  %v39_v2 = vld [vmem:[%s2204_s0 + $0x4] sm:$0xf] }
   0x2   :  { %24 = vst.msk [vmem:[#allocation2 + $0x4] sm:$0xf] %vm22_vm0, %v1712_v1  ;;  %vm45_vm3 = vsmask.f32 4368  ;;  %v48_v3 = vshrl.u32 %v38_v0, 16  ;;  %v51_v4 = vshll.u32 %v38_v0, 16 }
   0x3   :  { %26 = vst.msk [vmem:[#allocation2 + $0x8] sm:$0x1] %vm25_vm1, %v1712_v1  ;;  %v56_v5 = vshrl.u32 %v39_v2, 16  ;;  %v59_v6 = vshll.u32 %v39_v2, 16  ;;  %vm88_vm4 = vsmask.f32 7938  ;;  %vm1764_vm5 = vmor %vm44_vm2, %vm45_vm3 }
   0x4   :  { %v50_v7 = vrot.slane %v48_v3, 7  ;;  %27 = vst.msk [vmem:[#allocation2 + $0xc] sm:$0xf] %vm22_vm0, %v1712_v1  ;;  %v40_v10 = vld [vmem:[%s2204_s0 + $0x8] sm:$0xf]  ;;  %vm1775_vm6 = vmand %vm22_vm0, %vm88_vm4 }
   0x5   :  { %v58_v9 = vrot.slane %v56_v5, 7  ;;  %28 = vst.msk [vmem:[#allocation2 + $0x10] sm:$0xf] %vm22_vm0, %v1712_v1  ;;  %v41_v14 = vld [vmem:[%s2204_s0 + $0xc] sm:$0xf]  ;;  %v65_v15 = vshrl.u32 %v40_v10, 16 }
   0x6   :  { %v53_v11 = vor.u32 %v51_v4, %v50_v7  ;;  %v54_v12 = vrot.slane %v50_v7, 4  ;;  %29 = vst.msk [vmem:[#allocation2 + $0x14] sm:$0x1] %vm25_vm1, %v1712_v1  ;;  %v68_v18 = vshll.u32 %v40_v10, 16  ;;  %v73_v19 = vshrl.u32 %v41_v14, 16 }
   0x7   :  { %v61_v16 = vor.u32 %v59_v6, %v58_v9  ;;  %v63_v17 = vrot.slane %v58_v9, 4 }
   0x8   :  { %10 = vsyncpa [#allocation5], 0  ;;  %v90_v20 = vld [vmem:[#allocation2] sm:$0xf]  ;;  %v67_v22 = vrot.slane %v65_v15, 7  ;;  %v76_v23 = vshll.u32 %v41_v14, 16 }
   0x9   :  { %vm1786_vm7 = vmand %vm25_vm1, %vm44_vm2  ;;  %v62_v24 = vsel %vm1764_vm5, %v54_v12, %v61_v16  ;;  %v91_v25 = vsel %vm1775_vm6, %v53_v11, %v90_v20  ;;  %v75_v26 = vrot.slane %v73_v19, 7  ;;  %vm124_vm8 = vcmask 1046528   ;;  %s1713_s0 = smov 4   ;;  %s1714_s26 = smov 8   ;;  %v1392_v10 = vld [vmem:[%s2205_s1] sm:$0xf] }
   0xa   :  { %92 = vst [vmem:[#allocation2] sm:$0xf] %v91_v25  ;;  %v96_v27 = vld [vmem:[#allocation2 + $0x8] sm:$0x1]  ;;  %v70_v28 = vor.u32 %v68_v18, %v67_v22  ;;  %v71_v29 = vrot.slane %v67_v22, 4  ;;  %vm147_vm9 = vcmask 1045504  }
   0xb   :  { %93 = vst.msk [vmem:[#allocation2 + $0x4] sm:$0xf] %vm22_vm0, %v62_v24  ;;  %v97_v30 = vsel %vm1786_vm7, %v63_v17, %v96_v27  ;;  %v78_v31 = vor.u32 %v76_v23, %v75_v26  ;;  %v80_v32 = vrot.slane %v75_v26, 4  ;;  %v99_v33 = vld [vmem:[#allocation2 + $0xc] sm:$0xf]  ;;  %vm170_vm10 = vcmask 31744  }
   0xc   :  { %98 = vst [vmem:[#allocation2 + $0x8] sm:$0x1] %v97_v30  ;;  %v100_v34 = vsel %vm1775_vm6, %v70_v28, %v99_v33  ;;  %v1536_v11 = vld [vmem:[%s2205_s1] sm:$0x30]  ;;  %vm175_vm11 = vcmask 64512   ;;  %vm187_vm12 = vcmask 97280  }
   0xd   :  { %v79_v35 = vsel %vm1764_vm5, %v71_v29, %v78_v31  ;;  %101 = vst [vmem:[#allocation2 + $0xc] sm:$0xf] %v100_v34  ;;  %v103_v36 = vld [vmem:[#allocation2 + $0x14] sm:$0x1]  ;;  %v1393_v12 = vor.u32 %v1536_v11, %v1392_v10  ;;  %vm30_vm13 = vcmask 257024   ;;  %vm33_vm14 = vcmask 253952  }
   0xe   :  { %102 = vst.msk [vmem:[#allocation2 + $0x10] sm:$0xf] %vm22_vm0, %v79_v35  ;;  %v104_v37 = vsel %vm1786_vm7, %v80_v32, %v103_v36  ;;  %vm216_vm15 = vcmask 261120   ;;  %vm1876_vm6 = vmand %vm30_vm13, %vm88_vm4  ;;  %s1715_s15 = smov 32   ;;  %s1716_s16 = smov 64   ;;  %vm465_vm4 = vcmask 785408  }
   0xf   :  { %105 = vst [vmem:[#allocation2 + $0x14] sm:$0x1] %v104_v37  ;;  %v195_v13 = vsel %vm147_vm9, %v1393_v12, 0  ;;  %vm1882_vm7 = vmand %vm33_vm14, %vm44_vm2  ;;  %vm422_vm2 = vcmask 523264   ;;  %s1718_s27 = smov 128  }
  0x10   :  { %204 = vmatpush.bf16.msra.mxu0 %v195_v13  ;;  %31 = vst.msk [vmem:[#allocation3] sm:$0xf] %vm30_vm13, %v1712_v1 }
  0x11   :  { %32 = vst.msk [vmem:[#allocation3 + $0x4] sm:$0xf] %vm30_vm13, %v1712_v1 }
  0x12   :  { %v1562_v38 = vld [vmem:[#allocation2] sm:$0xff]   ;;  %34 = vst.msk [vmem:[#allocation3 + $0x8] sm:$0x1] %vm33_vm14, %v1712_v1 }
  0x13   :  { %v1563_v39 = vunpack.c.l.bf16 %v1562_v38  ;;  %v1564_v40 = vunpack.c.h.bf16 %v1562_v38  ;;  %v108_v41 = vld [vmem:[#allocation2 + $0x8] sm:$0x1]  ;;  %35 = vst.msk [vmem:[#allocation3 + $0xc] sm:$0xf] %vm30_vm13, %v1712_v1 }
  0x14   :  { %v114_v42 = vunpack.c.l.bf16 %v108_v41  ;;  %36 = vst.msk [vmem:[#allocation3 + $0x10] sm:$0xf] %vm30_vm13, %v1712_v1 }
  0x15   :  { %v125_v43 = vrot.slane %v1563_v39, 1  ;;  %v126_v44 = vrot.slane %v1564_v40, 1  ;;  %v109_v45 = vld [vmem:[#allocation2 + $0xc] sm:$0xff]   ;;  %v148_v51 = vrot.slane %v1563_v39, 2  ;;  %v149_v52 = vrot.slane %v1564_v40, 2 }
  0x16   :  { %v128_v46 = vrot.slane %v114_v42, 1  ;;  %v111_v47 = vld [vmem:[#allocation2 + $0x14] sm:$0x1]  ;;  %v115_v48 = vunpack.c.l.bf16 %v109_v45  ;;  %v116_v49 = vunpack.c.h.bf16 %v109_v45  ;;  %v151_v55 = vrot.slane %v114_v42, 2  ;;  %37 = vst.msk [vmem:[#allocation3 + $0x14] sm:$0x1] %vm33_vm14, %v1712_v1 }
  0x17   :  { %v127_v50 = vsel %vm124_vm8, %v125_v43, %v126_v44  ;;  %v117_v53 = vunpack.c.l.bf16 %v111_v47  ;;  %v150_v2 = vsel %vm147_vm9, %v148_v51, %v149_v52 }
  0x18   :  { %v129_v54 = vsel %vm124_vm8, %v126_v44, %v128_v46  ;;  %v130_v56 = vrot.slane %v115_v48, 1  ;;  %v131_v57 = vrot.slane %v116_v49, 1  ;;  %v153_v62 = vrot.slane %v115_v48, 2 }
  0x19   :  { %v1576_v58 = vpack.i.bf16 %v129_v54, %v127_v50  ;;  %v133_v59 = vrot.slane %v117_v53, 1  ;;  %v154_v63 = vrot.slane %v116_v49, 2  ;;  %v156_v0 = vrot.slane %v117_v53, 2 }
  0x1a   :  { %v132_v60 = vsel %vm124_vm8, %v130_v56, %v131_v57  ;;  %v152_v3 = vsel %vm147_vm9, %v149_v52, %v151_v55 }
  0x1b   :  { %1577 = vrot.lane.b32.xlu0 %v1576_v58, %s1713_s0  ;;  %v134_v61 = vsel %vm124_vm8, %v131_v57, %v133_v59  ;;  %v1581_v5 = vpack.i.bf16 %v152_v3, %v150_v2  ;;  %v155_v6 = vsel %vm147_vm9, %v153_v62, %v154_v63  ;;  %v157_v7 = vsel %vm147_vm9, %v154_v63, %v156_v0 }
  0x1c   :  { %v1586_v4 = vpack.i.bf16 %v134_v61, %v132_v60  ;;  %v1591_v9 = vpack.i.bf16 %v157_v7, %v155_v6 }
  0x1e   :  { %1587 = vrot.lane.b32.xlu1 %v1586_v4, %s1713_s0  ;;  %s1378_s0 = sshll.u32 %s2209_s5, 4  ;;  %s1379_s0 = int_to_ptr.hbm [resolvable:$true] %s1378_s0 }
  0x23   :  { %1582 = vrot.lane.b32.xlu0 %v1581_v5, %s1714_s26 }
  0x26   :  { %1592 = vrot.lane.b32.xlu1 %v1591_v9, %s1714_s26 }
  0x8d   :  { %v1578_v14 = vpop.permute.xlu0 %1577 }
  0x8e   :  { %v1580_v15 = vunpack.i.h.bf16 %v1578_v14  ;;  %v1579_v16 = vunpack.i.l.bf16 %v1578_v14 }
  0x90   :  { %v1588_v18 = vpop.permute.xlu1 %1587  ;;  %v172_v21 = vsel %vm170_vm10, %v1564_v40, %v1580_v15  ;;  %v171_v22 = vsel %vm170_vm10, %v1563_v39, %v1579_v16 }
  0x91   :  { %v1590_v26 = vunpack.i.h.bf16 %v1588_v18  ;;  %v1589_v27 = vunpack.i.l.bf16 %v1588_v18  ;;  %v252_v18 = vld [vmem:[%s2207_s3] sm:$0x1] }
  0x93   :  { %v174_v31 = vsel %vm170_vm10, %v116_v49, %v1590_v26  ;;  %v173_v32 = vsel %vm170_vm10, %v115_v48, %v1589_v27 }
  0x95   :  { %v1583_v17 = vpop.permute.xlu0 %1582 }
  0x96   :  { %v1585_v19 = vunpack.i.h.bf16 %v1583_v17  ;;  %v1584_v20 = vunpack.i.l.bf16 %v1583_v17 }
  0x98   :  { %v176_v23 = vsel %vm175_vm11, %v171_v22, %v1584_v20  ;;  %v177_v24 = vsel %vm175_vm11, %v172_v21, %v1585_v19  ;;  %v1593_v28 = vpop.permute.xlu1 %1592  ;;  %v253_v22 = vld [vmem:[%s2208_s4] sm:$0x1] }
  0x99   :  { %v180_v25 = vpack.c.bf16 %v177_v24, %v176_v23  ;;  %v1595_v29 = vunpack.i.h.bf16 %v1593_v28  ;;  %v1594_v30 = vunpack.i.l.bf16 %v1593_v28 }
  0x9b   :  { %1394 = vmatmul.msk.bf16.vlgmr.msra.gmra.mxu0 %vm187_vm12, %v180_v25  ;;  %v178_v33 = vsel %vm175_vm11, %v173_v32, %v1594_v30  ;;  %v179_v34 = vsel %vm175_vm11, %v174_v31, %v1595_v29 }
  0x9c   :  { %v181_v35 = vpack.c.bf16 %v179_v34, %v178_v33 }
  0xab   :  { %1395 = vmatmul.msk.bf16.gmra.mxu0 %vm187_vm12, %v181_v35 }
 0x118   :  { %v206_v36 = vpop.f32.mrf.mxu0 }
 0x119   :  { %v230_v40 = vmul.f32 %v206_v36, %v206_v36  ;;  %v217_v43 = vsel %vm216_vm15, %v206_v36, 0.0 }
 0x11b   :  { %v234_v47 = vsel %vm216_vm15, %v230_v40, 0.0 }
 0x120   :  { %v208_v37 = vpop.f32.mrf.mxu0 }
 0x121   :  { %v231_v39 = vmul.f32 %v208_v37, %v208_v37  ;;  %v218_v41 = vsel %vm216_vm15, %v208_v37, 0.0 }
 0x122   :  { %v219_v46 = vadd.f32 %v218_v41, %v217_v43 }
 0x123   :  { %v235_v44 = vsel %vm216_vm15, %v231_v39, 0.0 }
 0x124   :  { %v236_v48 = vadd.f32 %v235_v44, %v234_v47  ;;  %v340_v47 = vld [vmem:[#allocation3] sm:$0xf] }
 0x128   :  { %v211_v38 = vpop.f32.mrf.mxu0 }
 0x129   :  { %v232_v42 = vmul.f32 %v211_v38, %v211_v38  ;;  %v220_v45 = vsel %vm216_vm15, %v211_v38, 0.0 }
 0x12a   :  { %v221_v49 = vadd.f32 %v220_v45, %v219_v46 }
 0x12b   :  { %v237_v1 = vsel %vm216_vm15, %v232_v42, 0.0 }
 0x12c   :  { %v238_v53 = vadd.f32 %v237_v1, %v236_v48  ;;  %v1542_v1 = vld [vmem:[%s2206_s2 + $0x28] sm:$0xff] }
 0x12d   :  { %474 = vmatpush.bf16.msra.mxu1 %v1542_v1 }
 0x130   :  { %v213_v50 = vpop.f32.mrf.mxu0 }
 0x131   :  { %v222_v51 = vsel %vm216_vm15, %v213_v50, 0.0  ;;  %v233_v52 = vmul.f32 %v213_v50, %v213_v50 }
 0x132   :  { %v223_v54 = vadd.f32 %v222_v51, %v221_v49 }
 0x133   :  { %v239_v55 = vsel %vm216_vm15, %v233_v52, 0.0 }
 0x134   :  { %v224_v56 = vrot.slane %v223_v54, 4  ;;  %v240_v57 = vadd.f32 %v239_v55, %v238_v53  ;;  %v346_v53 = vld [vmem:[#allocation3 + $0x8] sm:$0x1] }
 0x136   :  { %v225_v58 = vadd.f32 %v224_v56, %v223_v54  ;;  %v241_v59 = vrot.slane %v240_v57, 4 }
 0x138   :  { %v226_v60 = vrot.slane %v225_v58, 2  ;;  %v242_v61 = vadd.f32 %v241_v59, %v240_v57  ;;  %v1541_v59 = vld [vmem:[%s2206_s2 + $0x20] sm:$0xff] }
 0x139   :  { %475 = vmatpush.bf16.msra.mxu1 %v1541_v59 }
 0x13a   :  { %v227_v62 = vadd.f32 %v226_v60, %v225_v58  ;;  %v243_v63 = vrot.slane %v242_v61, 2 }
 0x13c   :  { %v228_v0 = vrot.slane %v227_v62, 1  ;;  %v244_v2 = vadd.f32 %v243_v63, %v242_v61 }
 0x13e   :  { %v229_v3 = vadd.f32 %v228_v0, %v227_v62  ;;  %v245_v4 = vrot.slane %v244_v2, 1  ;;  %v349_v0 = vld [vmem:[#allocation3 + $0xc] sm:$0xf] }
 0x140   :  { %v246_v5 = vadd.f32 %v245_v4, %v244_v2  ;;  %v247_v6 = vmul.f32 0.03125, %v229_v3 }
 0x142   :  { %v248_v7 = vmul.f32 0.03125, %v246_v5  ;;  %v249_v9 = vmul.f32 %v247_v6, %v247_v6 }
 0x144   :  { %v250_v10 = vsub.f32 %v248_v7, %v249_v9 }
 0x146   :  { %v251_v11 = vmax.f32 %v250_v10, 0.0  ;;  %v353_v10 = vld [vmem:[#allocation3 + $0x14] sm:$0x1] }
 0x148   :  { %v254_v12 = vadd.f32 1e-05, %v251_v11 }
 0x14a   :  { %1676 = vrsqrt.f32 %v254_v12  ;;  %vm261_vm1 = vweird.f32 %v254_v12 }
 0x150   :  { %v1677_v13 = vpop.eup %1676 }
 0x151   :  { %v256_v14 = vmul.f32 %v1677_v13, %v254_v12  ;;  %vm262_vm0 = vweird.f32 %v1677_v13  ;;  %v1540_v12 = vld [vmem:[%s2206_s2 + $0x18] sm:$0xff] }
 0x152   :  { %vm263_vm3 = vmor %vm261_vm1, %vm262_vm0  ;;  %476 = vmatpush.bf16.msra.mxu1 %v1540_v12 }
 0x153   :  { %v257_v15 = vmul.f32 %v1677_v13, %v256_v14 }
 0x155   :  { %v258_v16 = vmul.f32 0.5, %v257_v15 }
 0x157   :  { %v259_v17 = vsub.f32 1.5, %v258_v16 }
 0x159   :  { %v260_v19 = vmul.f32 %v1677_v13, %v259_v17 }
 0x15b   :  { %v264_v20 = vsel %vm263_vm3, %v1677_v13, %v260_v19 }
 0x15c   :  { %v265_v21 = vmul.f32 %v264_v20, %v252_v18 }
 0x15e   :  { %v266_v23 = vmul.f32 %v265_v21, %v247_v6  ;;  %v268_v24 = vperm.slane %v265_v21, 0 }
 0x160   :  { %v267_v25 = vsub.f32 %v253_v22, %v266_v23  ;;  %v269_v26 = vmul.f32 %v268_v24, %v206_v36  ;;  %v270_v27 = vmul.f32 %v268_v24, %v208_v37  ;;  %v271_v28 = vmul.f32 %v268_v24, %v211_v38 }
 0x161   :  { %v272_v29 = vmul.f32 %v268_v24, %v213_v50 }
 0x162   :  { %v273_v30 = vperm.slane %v267_v25, 0 }
 0x164   :  { %v274_v31 = vadd.f32 %v273_v30, %v269_v26  ;;  %v275_v32 = vadd.f32 %v273_v30, %v270_v27  ;;  %v276_v33 = vadd.f32 %v273_v30, %v271_v28  ;;  %v277_v34 = vadd.f32 %v273_v30, %v272_v29 }
 0x166   :  { %v1855_v35 = vmax.f32 %v274_v31, 0.0  ;;  %v1857_v39 = vmax.f32 %v275_v32, 0.0  ;;  %v1859_v40 = vmax.f32 %v276_v33, 0.0  ;;  %v1861_v41 = vmax.f32 %v277_v34, 0.0 }
 0x168   :  { %v294_v42 = vpack.c.bf16 %v1855_v35, %v1855_v35  ;;  %v295_v36 = vpack.c.bf16 %v1857_v39, %v1857_v39  ;;  %v296_v37 = vpack.c.bf16 %v1859_v40, %v1859_v40  ;;  %v297_v38 = vpack.c.bf16 %v1861_v41, %v1861_v41 }
 0x16a   :  { %v299_v43 = vshrl.u32 %v294_v42, 16  ;;  %v307_v44 = vshrl.u32 %v295_v36, 16  ;;  %v316_v45 = vshrl.u32 %v296_v37, 16  ;;  %v324_v46 = vshrl.u32 %v297_v38, 16 }
 0x16b   :  { %v302_v49 = vshll.u32 %v294_v42, 16  ;;  %v310_v51 = vshll.u32 %v295_v36, 16  ;;  %v319_v55 = vshll.u32 %v296_v37, 16  ;;  %v327_v57 = vshll.u32 %v297_v38, 16 }
 0x16c   :  { %v301_v48 = vrot.slane %v299_v43, 7  ;;  %v309_v50 = vrot.slane %v307_v44, 7  ;;  %v318_v54 = vrot.slane %v316_v45, 7  ;;  %v326_v56 = vrot.slane %v324_v46, 7 }
 0x16e   :  { %v304_v60 = vor.u32 %v302_v49, %v301_v48  ;;  %v305_v61 = vrot.slane %v301_v48, 4  ;;  %v312_v62 = vor.u32 %v310_v51, %v309_v50  ;;  %v314_v63 = vrot.slane %v309_v50, 4 }
 0x16f   :  { %v321_v2 = vor.u32 %v319_v55, %v318_v54  ;;  %v322_v3 = vrot.slane %v318_v54, 4  ;;  %v329_v4 = vor.u32 %v327_v57, %v326_v56  ;;  %v331_v5 = vrot.slane %v326_v56, 4  ;;  %v1539_v54 = vld [vmem:[%s2206_s2 + $0x10] sm:$0xff]  ;;  %v1538_v55 = vld [vmem:[%s2206_s2 + $0x8] sm:$0xff]  ;;  %v1537_v56 = vld [vmem:[%s2206_s2] sm:$0xff] }
 0x170   :  { %v313_v6 = vsel %vm1764_vm5, %v305_v61, %v312_v62  ;;  %v341_v7 = vsel %vm1876_vm6, %v304_v60, %v340_v47  ;;  %v347_v9 = vsel %vm1882_vm7, %v314_v63, %v346_v53  ;;  %477 = vmatpush.bf16.msra.mxu1 %v1539_v54 }
 0x171   :  { %342 = vst [vmem:[#allocation3] sm:$0xf] %v341_v7  ;;  %v350_v11 = vsel %vm1876_vm6, %v321_v2, %v349_v0  ;;  %v330_v13 = vsel %vm1764_vm5, %v322_v3, %v329_v4  ;;  %v354_v14 = vsel %vm1882_vm7, %v331_v5, %v353_v10 }
 0x172   :  { %343 = vst.msk [vmem:[#allocation3 + $0x4] sm:$0xf] %vm30_vm13, %v313_v6 }
 0x173   :  { %348 = vst [vmem:[#allocation3 + $0x8] sm:$0x1] %v347_v9 }
 0x174   :  { %351 = vst [vmem:[#allocation3 + $0xc] sm:$0xf] %v350_v11  ;;  %478 = vmatpush.bf16.msra.mxu1 %v1538_v55 }
 0x175   :  { %352 = vst.msk [vmem:[#allocation3 + $0x10] sm:$0xf] %vm30_vm13, %v330_v13 }
 0x176   :  { %355 = vst [vmem:[#allocation3 + $0x14] sm:$0x1] %v354_v14 }
 0x178   :  { %v1906_v15 = vld [vmem:[#allocation3] sm:$0xf]  ;;  %479 = vmatpush.bf16.msra.mxu1 %v1537_v56 }
 0x179   :  { %v357_v16 = vld [vmem:[#allocation3 + $0x4] sm:$0xf]  ;;  %v362_v17 = vunpack.c.l.bf16 %v1906_v15 }
 0x17a   :  { %v358_v18 = vld [vmem:[#allocation3 + $0x8] sm:$0x1]  ;;  %v363_v19 = vunpack.c.l.bf16 %v357_v16 }
 0x17b   :  { %v364_v20 = vunpack.c.l.bf16 %v358_v18  ;;  %v374_v21 = vrot.slane %v362_v17, 1  ;;  %v396_v44 = vrot.slane %v362_v17, 2 }
 0x17c   :  { %v359_v22 = vld [vmem:[#allocation3 + $0xc] sm:$0xff]   ;;  %v375_v23 = vrot.slane %v363_v19, 1  ;;  %v397_v47 = vrot.slane %v363_v19, 2 }
 0x17d   :  { %v361_v24 = vld [vmem:[#allocation3 + $0x14] sm:$0x1]  ;;  %v365_v25 = vunpack.c.l.bf16 %v359_v22  ;;  %v366_v26 = vunpack.c.h.bf16 %v359_v22  ;;  %v377_v27 = vrot.slane %v364_v20, 1  ;;  %v399_v1 = vrot.slane %v364_v20, 2 }
 0x17e   :  { %v367_v28 = vunpack.c.l.bf16 %v361_v24  ;;  %v376_v29 = vsel %vm124_vm8, %v374_v21, %v375_v23  ;;  %v398_v50 = vsel %vm147_vm9, %v396_v44, %v397_v47 }
 0x17f   :  { %v401_v30 = vrot.slane %v365_v25, 2  ;;  %v402_v31 = vrot.slane %v366_v26, 2  ;;  %v379_v32 = vrot.slane %v365_v25, 1  ;;  %v380_v33 = vrot.slane %v366_v26, 1 }
 0x180   :  { %v404_v34 = vrot.slane %v367_v28, 2  ;;  %v382_v42 = vrot.slane %v367_v28, 1  ;;  %v378_v36 = vsel %vm124_vm8, %v375_v23, %v377_v27  ;;  %v400_v51 = vsel %vm147_vm9, %v397_v47, %v399_v1 }
 0x181   :  { %v403_v37 = vsel %vm147_vm9, %v401_v30, %v402_v31  ;;  %v381_v38 = vsel %vm124_vm8, %v379_v32, %v380_v33  ;;  %v1596_v43 = vpack.i.bf16 %v378_v36, %v376_v29  ;;  %v1601_v53 = vpack.i.bf16 %v400_v51, %v398_v50 }
 0x182   :  { %v405_v45 = vsel %vm147_vm9, %v402_v31, %v404_v34  ;;  %v383_v46 = vsel %vm124_vm8, %v380_v33, %v382_v42 }
 0x183   :  { %v1611_v48 = vpack.i.bf16 %v405_v45, %v403_v37  ;;  %v1606_v49 = vpack.i.bf16 %v383_v46, %v381_v38  ;;  %1597 = vrot.lane.b32.xlu2 %v1596_v43, %s1715_s15 }
 0x185   :  { %1612 = vrot.lane.b32.xlu1 %v1611_v48, %s1716_s16  ;;  %1607 = vrot.lane.b32.xlu0 %v1606_v49, %s1715_s15 }
 0x18b   :  { %1602 = vrot.lane.b32.xlu2 %v1601_v53, %s1716_s16 }
 0x1dd   :  { %v1598_v57 = vpop.permute.xlu2 %1597 }
 0x1de   :  { %v1600_v59 = vunpack.i.h.bf16 %v1598_v57  ;;  %v1599_v60 = vunpack.i.l.bf16 %v1598_v57 }
 0x1e0   :  { %v419_v0 = vsel %vm216_vm15, %v363_v19, %v1600_v59  ;;  %v418_v2 = vsel %vm216_vm15, %v362_v17, %v1599_v60 }
 0x1e5   :  { %v1603_v61 = vpop.permute.xlu2 %1602 }
 0x1e6   :  { %v1605_v62 = vunpack.i.h.bf16 %v1603_v61  ;;  %v1604_v63 = vunpack.i.l.bf16 %v1603_v61 }
 0x1e8   :  { %v423_v3 = vsel %vm422_vm2, %v418_v2, %v1604_v63  ;;  %v424_v4 = vsel %vm422_vm2, %v419_v0, %v1605_v62 }
 0x1e9   :  { %v427_v5 = vpack.c.bf16 %v424_v4, %v423_v3 }
 0x1eb   :  { %1420 = vmatmul.msk.bf16.vlgmr.msra.gmra.mxu1 %vm465_vm4, %v427_v5 }
 0x1f7   :  { %v1613_v6 = vpop.permute.xlu1 %1612  ;;  %v1608_v7 = vpop.permute.xlu0 %1607 }
 0x1f8   :  { %v1615_v9 = vunpack.i.h.bf16 %v1613_v6  ;;  %v1614_v10 = vunpack.i.l.bf16 %v1613_v6  ;;  %v1610_v11 = vunpack.i.h.bf16 %v1608_v7  ;;  %v1609_v12 = vunpack.i.l.bf16 %v1608_v7  ;;  %v526_v6 = vld [vmem:[%s2207_s3 + $0x1] sm:$0x1] }
 0x1fa   :  { %v421_v13 = vsel %vm216_vm15, %v366_v26, %v1610_v11  ;;  %v420_v14 = vsel %vm216_vm15, %v365_v25, %v1609_v12  ;;  %v527_v11 = vld [vmem:[%s2208_s4 + $0x1] sm:$0x1] }
 0x1fb   :  { %v425_v16 = vsel %vm422_vm2, %v420_v14, %v1614_v10  ;;  %v426_v17 = vsel %vm422_vm2, %v421_v13, %v1615_v9 }
 0x1fc   :  { %v428_v18 = vpack.c.bf16 %v426_v17, %v425_v16 }
 0x1fe   :  { %1421 = vmatmul.msk.bf16.gmra.mxu1 %vm465_vm4, %v428_v18 }
 0x268   :  { %v481_v19 = vpop.f32.mrf.mxu1 }
 0x269   :  { %v504_v23 = vmul.f32 %v481_v19, %v481_v19  ;;  %v491_v28 = vsel %vm216_vm15, %v481_v19, 0.0 }
 0x26b   :  { %v508_v30 = vsel %vm216_vm15, %v504_v23, 0.0 }
 0x270   :  { %v483_v20 = vpop.f32.mrf.mxu1 }
 0x271   :  { %v505_v22 = vmul.f32 %v483_v20, %v483_v20  ;;  %v492_v24 = vsel %vm216_vm15, %v483_v20, 0.0 }
 0x272   :  { %v493_v29 = vadd.f32 %v492_v24, %v491_v28 }
 0x273   :  { %v509_v26 = vsel %vm216_vm15, %v505_v22, 0.0 }
 0x274   :  { %v510_v32 = vadd.f32 %v509_v26, %v508_v30 }
 0x27b   :  { %v486_v21 = vpop.f32.mrf.mxu1 }
 0x27c   :  { %v506_v27 = vmul.f32 %v486_v21, %v486_v21  ;;  %v494_v25 = vsel %vm216_vm15, %v486_v21, 0.0 }
 0x27d   :  { %v495_v33 = vadd.f32 %v494_v25, %v493_v29 }
 0x27e   :  { %v511_v31 = vsel %vm216_vm15, %v506_v27, 0.0 }
 0x27f   :  { %v512_v37 = vadd.f32 %v511_v31, %v510_v32 }
 0x283   :  { %v488_v34 = vpop.f32.mrf.mxu1 }
 0x284   :  { %v496_v42 = vsel %vm216_vm15, %v488_v34, 0.0  ;;  %v507_v36 = vmul.f32 %v488_v34, %v488_v34 }
 0x285   :  { %v497_v38 = vadd.f32 %v496_v42, %v495_v33 }
 0x286   :  { %v513_v43 = vsel %vm216_vm15, %v507_v36, 0.0 }
 0x287   :  { %v498_v44 = vrot.slane %v497_v38, 4  ;;  %v514_v45 = vadd.f32 %v513_v43, %v512_v37 }
 0x289   :  { %v499_v46 = vadd.f32 %v498_v44, %v497_v38  ;;  %v515_v47 = vrot.slane %v514_v45, 4 }
 0x28b   :  { %v500_v1 = vrot.slane %v499_v46, 2  ;;  %v516_v48 = vadd.f32 %v515_v47, %v514_v45 }
 0x28d   :  { %v501_v49 = vadd.f32 %v500_v1, %v499_v46  ;;  %v517_v50 = vrot.slane %v516_v48, 2 }
 0x28f   :  { %v502_v51 = vrot.slane %v501_v49, 1  ;;  %v518_v53 = vadd.f32 %v517_v50, %v516_v48 }
 0x291   :  { %v503_v54 = vadd.f32 %v502_v51, %v501_v49  ;;  %v519_v55 = vrot.slane %v518_v53, 1 }
 0x293   :  { %v520_v56 = vadd.f32 %v519_v55, %v518_v53  ;;  %v521_v57 = vmul.f32 0.03125, %v503_v54 }
 0x295   :  { %v522_v59 = vmul.f32 0.03125, %v520_v56  ;;  %v523_v60 = vmul.f32 %v521_v57, %v521_v57 }
 0x297   :  { %v524_v61 = vsub.f32 %v522_v59, %v523_v60 }
 0x299   :  { %v525_v62 = vmax.f32 %v524_v61, 0.0 }
 0x29b   :  { %v528_v63 = vadd.f32 1e-05, %v525_v62  ;;  %v619_v62 = vld [vmem:[#allocation3 + $0xc] sm:$0xf] }
 0x29d   :  { %1678 = vrsqrt.f32 %v528_v63  ;;  %vm535_vm11 = vweird.f32 %v528_v63 }
 0x2a3   :  { %v1679_v0 = vpop.eup %1678 }
 0x2a4   :  { %v530_v2 = vmul.f32 %v1679_v0, %v528_v63  ;;  %vm536_vm10 = vweird.f32 %v1679_v0 }
 0x2a5   :  { %vm537_vm12 = vmor %vm535_vm11, %vm536_vm10 }
 0x2a6   :  { %v531_v3 = vmul.f32 %v1679_v0, %v530_v2  ;;  %v623_v2 = vld [vmem:[#allocation3 + $0x14] sm:$0x1] }
 0x2a8   :  { %v532_v4 = vmul.f32 0.5, %v531_v3 }
 0x2aa   :  { %v533_v5 = vsub.f32 1.5, %v532_v4 }
 0x2ac   :  { %v534_v7 = vmul.f32 %v1679_v0, %v533_v5 }
 0x2ae   :  { %v538_v9 = vsel %vm537_vm12, %v1679_v0, %v534_v7 }
 0x2af   :  { %v539_v10 = vmul.f32 %v538_v9, %v526_v6 }
 0x2b1   :  { %v540_v12 = vmul.f32 %v539_v10, %v521_v57  ;;  %v542_v13 = vperm.slane %v539_v10, 0  ;;  %v616_v57 = vld [vmem:[#allocation3 + $0x8] sm:$0x1] }
 0x2b3   :  { %v541_v14 = vsub.f32 %v527_v11, %v540_v12  ;;  %v543_v16 = vmul.f32 %v542_v13, %v481_v19  ;;  %v544_v17 = vmul.f32 %v542_v13, %v483_v20  ;;  %v545_v18 = vmul.f32 %v542_v13, %v486_v21 }
 0x2b4   :  { %v546_v22 = vmul.f32 %v542_v13, %v488_v34 }
 0x2b5   :  { %v547_v23 = vperm.slane %v541_v14, 0 }
 0x2b7   :  { %v548_v24 = vadd.f32 %v547_v23, %v543_v16  ;;  %v549_v27 = vadd.f32 %v547_v23, %v544_v17  ;;  %v550_v28 = vadd.f32 %v547_v23, %v545_v18  ;;  %v551_v26 = vadd.f32 %v547_v23, %v546_v22 }
 0x2b9   :  { %v552_v25 = vmax.f32 %v548_v24, 0.0  ;;  %v553_v29 = vmax.f32 %v549_v27, 0.0  ;;  %v554_v30 = vmax.f32 %v550_v28, 0.0  ;;  %v555_v31 = vmax.f32 %v551_v26, 0.0 }
 0x2bb   :  { %v569_v32 = vpack.c.bf16 %v552_v25, %v552_v25  ;;  %v570_v33 = vpack.c.bf16 %v553_v29, %v553_v29  ;;  %v571_v42 = vpack.c.bf16 %v554_v30, %v554_v30  ;;  %v572_v36 = vpack.c.bf16 %v555_v31, %v555_v31 }
 0x2bd   :  { %v574_v37 = vshrl.u32 %v569_v32, 16  ;;  %v582_v38 = vshrl.u32 %v570_v33, 16  ;;  %v591_v43 = vshrl.u32 %v571_v42, 16  ;;  %v599_v19 = vshrl.u32 %v572_v36, 16 }
 0x2be   :  { %v577_v21 = vshll.u32 %v569_v32, 16  ;;  %v585_v44 = vshll.u32 %v570_v33, 16  ;;  %v594_v46 = vshll.u32 %v571_v42, 16  ;;  %v602_v1 = vshll.u32 %v572_v36, 16 }
 0x2bf   :  { %v576_v20 = vrot.slane %v574_v37, 7  ;;  %v584_v34 = vrot.slane %v582_v38, 7  ;;  %v593_v45 = vrot.slane %v591_v43, 7  ;;  %v601_v47 = vrot.slane %v599_v19, 7 }
 0x2c1   :  { %v579_v48 = vor.u32 %v577_v21, %v576_v20  ;;  %v580_v49 = vrot.slane %v576_v20, 4  ;;  %v587_v50 = vor.u32 %v585_v44, %v584_v34  ;;  %v589_v51 = vrot.slane %v584_v34, 4  ;;  %v1548_v44 = vld [vmem:[%s2206_s2 + $0x58] sm:$0xff] }
 0x2c2   :  { %v596_v53 = vor.u32 %v594_v46, %v593_v45  ;;  %v597_v54 = vrot.slane %v593_v45, 4  ;;  %v604_v55 = vor.u32 %v602_v1, %v601_v47  ;;  %v606_v56 = vrot.slane %v601_v47, 4  ;;  %742 = vmatpush.bf16.msra.mxu2 %v1548_v44  ;;  %v1547_v45 = vld [vmem:[%s2206_s2 + $0x50] sm:$0xff]  ;;  %v1546_v46 = vld [vmem:[%s2206_s2 + $0x48] sm:$0xff]  ;;  %v1545_v47 = vld [vmem:[%s2206_s2 + $0x40] sm:$0xff] }
 0x2c3   :  { %v588_v59 = vsel %vm1764_vm5, %v580_v49, %v587_v50  ;;  %v613_v60 = vsel %vm1876_vm6, %v579_v48, %v1906_v15  ;;  %v617_v61 = vsel %vm1882_vm7, %v589_v51, %v616_v57  ;;  %v1544_v1 = vld [vmem:[%s2206_s2 + $0x38] sm:$0xff]  ;;  %v1543_v48 = vld [vmem:[%s2206_s2 + $0x30] sm:$0xff] }
 0x2c4   :  { %614 = vst [vmem:[#allocation3] sm:$0xf] %v613_v60  ;;  %v620_v63 = vsel %vm1876_vm6, %v596_v53, %v619_v62  ;;  %v605_v0 = vsel %vm1764_vm5, %v597_v54, %v604_v55  ;;  %v624_v3 = vsel %vm1882_vm7, %v606_v56, %v623_v2 }
 0x2c5   :  { %615 = vst.msk [vmem:[#allocation3 + $0x4] sm:$0xf] %vm30_vm13, %v588_v59 }
 0x2c6   :  { %618 = vst [vmem:[#allocation3 + $0x8] sm:$0x1] %v617_v61  ;;  %743 = vmatpush.bf16.msra.mxu2 %v1547_v45 }
 0x2c7   :  { %621 = vst [vmem:[#allocation3 + $0xc] sm:$0xf] %v620_v63 }
 0x2c8   :  { %622 = vst.msk [vmem:[#allocation3 + $0x10] sm:$0xf] %vm30_vm13, %v605_v0 }
 0x2c9   :  { %625 = vst [vmem:[#allocation3 + $0x14] sm:$0x1] %v624_v3 }
 0x2ca   :  { %744 = vmatpush.bf16.msra.mxu2 %v1546_v46 }
 0x2cb   :  { %v1969_v15 = vld [vmem:[#allocation3] sm:$0xf] }
 0x2cc   :  { %v627_v4 = vld [vmem:[#allocation3 + $0x4] sm:$0xf]  ;;  %v632_v5 = vunpack.c.l.bf16 %v1969_v15 }
 0x2cd   :  { %v628_v6 = vld [vmem:[#allocation3 + $0x8] sm:$0x1]  ;;  %v633_v7 = vunpack.c.l.bf16 %v627_v4 }
 0x2ce   :  { %v634_v9 = vunpack.c.l.bf16 %v628_v6  ;;  %v666_v10 = vrot.slane %v632_v5, 2  ;;  %v644_v11 = vrot.slane %v632_v5, 1  ;;  %745 = vmatpush.bf16.msra.mxu2 %v1545_v47 }
 0x2cf   :  { %v629_v12 = vld [vmem:[#allocation3 + $0xc] sm:$0xff]   ;;  %v667_v13 = vrot.slane %v633_v7, 2  ;;  %v645_v14 = vrot.slane %v633_v7, 1 }
 0x2d0   :  { %v631_v16 = vld [vmem:[#allocation3 + $0x14] sm:$0x1]  ;;  %v635_v17 = vunpack.c.l.bf16 %v629_v12  ;;  %v636_v18 = vunpack.c.h.bf16 %v629_v12  ;;  %v669_v22 = vrot.slane %v634_v9, 2  ;;  %v647_v23 = vrot.slane %v634_v9, 1 }
 0x2d1   :  { %v637_v24 = vunpack.c.l.bf16 %v631_v16  ;;  %v668_v27 = vsel %vm147_vm9, %v666_v10, %v667_v13  ;;  %v646_v28 = vsel %vm124_vm8, %v644_v11, %v645_v14 }
 0x2d2   :  { %v649_v26 = vrot.slane %v635_v17, 1  ;;  %v650_v25 = vrot.slane %v636_v18, 1  ;;  %v670_v29 = vsel %vm147_vm9, %v667_v13, %v669_v22  ;;  %v648_v30 = vsel %vm124_vm8, %v645_v14, %v647_v23  ;;  %746 = vmatpush.bf16.msra.mxu2 %v1544_v1 }
 0x2d3   :  { %v652_v31 = vrot.slane %v637_v24, 1  ;;  %v1621_v32 = vpack.i.bf16 %v670_v29, %v668_v27  ;;  %v1616_v33 = vpack.i.bf16 %v648_v30, %v646_v28  ;;  %v671_v36 = vrot.slane %v635_v17, 2 }
 0x2d4   :  { %v651_v42 = vsel %vm124_vm8, %v649_v26, %v650_v25  ;;  %v672_v37 = vrot.slane %v636_v18, 2  ;;  %v674_v38 = vrot.slane %v637_v24, 2 }
 0x2d5   :  { %v653_v43 = vsel %vm124_vm8, %v650_v25, %v652_v31  ;;  %1622 = vrot.lane.b32.xlu0 %v1621_v32, %s1716_s16  ;;  %1617 = vrot.lane.b32.xlu2 %v1616_v33, %s1715_s15 }
 0x2d6   :  { %v1626_v19 = vpack.i.bf16 %v653_v43, %v651_v42  ;;  %v673_v20 = vsel %vm147_vm9, %v671_v36, %v672_v37  ;;  %v675_v21 = vsel %vm147_vm9, %v672_v37, %v674_v38  ;;  %747 = vmatpush.bf16.msra.mxu2 %v1543_v48 }
 0x2d7   :  { %v1631_v34 = vpack.i.bf16 %v675_v21, %v673_v20 }
 0x2d8   :  { %1627 = vrot.lane.b32.xlu1 %v1626_v19, %s1715_s15 }
 0x2dd   :  { %1632 = vrot.lane.b32.xlu2 %v1631_v34, %s1716_s16 }
 0x32f   :  { %v1618_v49 = vpop.permute.xlu2 %1617 }
 0x330   :  { %v1620_v50 = vunpack.i.h.bf16 %v1618_v49  ;;  %v1619_v51 = vunpack.i.l.bf16 %v1618_v49 }
 0x332   :  { %v689_v56 = vsel %vm216_vm15, %v633_v7, %v1620_v50  ;;  %v688_v57 = vsel %vm216_vm15, %v632_v5, %v1619_v51 }
 0x337   :  { %v1633_v2 = vpop.permute.xlu2 %1632 }
 0x338   :  { %v1635_v6 = vunpack.i.h.bf16 %v1633_v2  ;;  %v1634_v9 = vunpack.i.l.bf16 %v1633_v2 }
 0x347   :  { %v1623_v53 = vpop.permute.xlu0 %1622 }
 0x348   :  { %v1625_v54 = vunpack.i.h.bf16 %v1623_v53  ;;  %v1624_v55 = vunpack.i.l.bf16 %v1623_v53 }
 0x34a   :  { %v692_v59 = vsel %vm422_vm2, %v688_v57, %v1624_v55  ;;  %v693_v60 = vsel %vm422_vm2, %v689_v56, %v1625_v54  ;;  %v1628_v62 = vpop.permute.xlu1 %1627 }
 0x34b   :  { %v696_v61 = vpack.c.bf16 %v693_v60, %v692_v59  ;;  %v1630_v63 = vunpack.i.h.bf16 %v1628_v62  ;;  %v1629_v0 = vunpack.i.l.bf16 %v1628_v62  ;;  %v794_v62 = vld [vmem:[%s2207_s3 + $0x2] sm:$0x1] }
 0x34d   :  { %1458 = vmatmul.msk.bf16.vlgmr.msra.gmra.mxu2 %vm465_vm4, %v696_v61  ;;  %v691_v3 = vsel %vm216_vm15, %v636_v18, %v1630_v63  ;;  %v690_v4 = vsel %vm216_vm15, %v635_v17, %v1629_v0 }
 0x34e   :  { %v694_v7 = vsel %vm422_vm2, %v690_v4, %v1634_v9  ;;  %v695_v5 = vsel %vm422_vm2, %v691_v3, %v1635_v6  ;;  %v795_v3 = vld [vmem:[%s2208_s4 + $0x2] sm:$0x1] }
 0x34f   :  { %v697_v10 = vpack.c.bf16 %v695_v5, %v694_v7 }
 0x35d   :  { %1459 = vmatmul.msk.bf16.gmra.mxu2 %vm465_vm4, %v697_v10 }
 0x3d0   :  { %v749_v11 = vpop.f32.mrf.mxu2 }
 0x3d1   :  { %v772_v16 = vmul.f32 %v749_v11, %v749_v11  ;;  %v759_v18 = vsel %vm216_vm15, %v749_v11, 0.0 }
 0x3d3   :  { %v776_v28 = vsel %vm216_vm15, %v772_v16, 0.0 }
 0x3d8   :  { %v751_v12 = vpop.f32.mrf.mxu2 }
 0x3d9   :  { %v773_v14 = vmul.f32 %v751_v12, %v751_v12  ;;  %v760_v22 = vsel %vm216_vm15, %v751_v12, 0.0 }
 0x3da   :  { %v761_v27 = vadd.f32 %v760_v22, %v759_v18 }
 0x3db   :  { %v777_v17 = vsel %vm216_vm15, %v773_v14, 0.0 }
 0x3dc   :  { %v778_v25 = vadd.f32 %v777_v17, %v776_v28 }
 0x3e0   :  { %v754_v13 = vpop.f32.mrf.mxu2 }
 0x3e1   :  { %v774_v23 = vmul.f32 %v754_v13, %v754_v13  ;;  %v762_v24 = vsel %vm216_vm15, %v754_v13, 0.0 }
 0x3e2   :  { %v763_v29 = vadd.f32 %v762_v24, %v761_v27 }
 0x3e3   :  { %v779_v26 = vsel %vm216_vm15, %v774_v23, 0.0 }
 0x3e4   :  { %v780_v33 = vadd.f32 %v779_v26, %v778_v25 }
 0x3e8   :  { %v756_v30 = vpop.f32.mrf.mxu2 }
 0x3e9   :  { %v764_v31 = vsel %vm216_vm15, %v756_v30, 0.0  ;;  %v775_v32 = vmul.f32 %v756_v30, %v756_v30 }
 0x3ea   :  { %v765_v42 = vadd.f32 %v764_v31, %v763_v29 }
 0x3eb   :  { %v781_v36 = vsel %vm216_vm15, %v775_v32, 0.0 }
 0x3ec   :  { %v766_v37 = vrot.slane %v765_v42, 4  ;;  %v782_v38 = vadd.f32 %v781_v36, %v780_v33 }
 0x3ee   :  { %v767_v43 = vadd.f32 %v766_v37, %v765_v42  ;;  %v783_v19 = vrot.slane %v782_v38, 4 }
 0x3f0   :  { %v768_v20 = vrot.slane %v767_v43, 2  ;;  %v784_v21 = vadd.f32 %v783_v19, %v782_v38 }
 0x3f2   :  { %v769_v34 = vadd.f32 %v768_v20, %v767_v43  ;;  %v785_v44 = vrot.slane %v784_v21, 2 }
 0x3f4   :  { %v770_v45 = vrot.slane %v769_v34, 1  ;;  %v786_v46 = vadd.f32 %v785_v44, %v784_v21 }
 0x3f6   :  { %v771_v47 = vadd.f32 %v770_v45, %v769_v34  ;;  %v787_v1 = vrot.slane %v786_v46, 1 }
 0x3f8   :  { %v788_v48 = vadd.f32 %v787_v1, %v786_v46  ;;  %v789_v49 = vmul.f32 0.03125, %v771_v47 }
 0x3fa   :  { %v790_v50 = vmul.f32 0.03125, %v788_v48  ;;  %v791_v51 = vmul.f32 %v789_v49, %v789_v49 }
 0x3fc   :  { %v792_v53 = vsub.f32 %v790_v50, %v791_v51  ;;  %v891_v51 = vld [vmem:[#allocation3 + $0xc] sm:$0xf] }
 0x3fe   :  { %v793_v54 = vmax.f32 %v792_v53, 0.0 }
 0x400   :  { %v796_v55 = vadd.f32 1e-05, %v793_v54 }
 0x402   :  { %1680 = vrsqrt.f32 %v796_v55  ;;  %vm803_vm0 = vweird.f32 %v796_v55 }
 0x408   :  { %v1681_v56 = vpop.eup %1680 }
 0x409   :  { %v798_v57 = vmul.f32 %v1681_v56, %v796_v55  ;;  %vm804_vm14 = vweird.f32 %v1681_v56  ;;  %v895_v55 = vld [vmem:[#allocation3 + $0x14] sm:$0x1] }
 0x40a   :  { %vm805_vm1 = vmor %vm803_vm0, %vm804_vm14 }
 0x40b   :  { %v799_v59 = vmul.f32 %v1681_v56, %v798_v57 }
 0x40d   :  { %v800_v60 = vmul.f32 0.5, %v799_v59 }
 0x40f   :  { %v801_v61 = vsub.f32 1.5, %v800_v60 }
 0x411   :  { %v802_v63 = vmul.f32 %v1681_v56, %v801_v61 }
 0x413   :  { %v806_v0 = vsel %vm805_vm1, %v1681_v56, %v802_v63  ;;  %v888_v56 = vld [vmem:[#allocation3 + $0x8] sm:$0x1] }
 0x414   :  { %v807_v2 = vmul.f32 %v806_v0, %v794_v62 }
 0x416   :  { %v808_v4 = vmul.f32 %v807_v2, %v789_v49  ;;  %v810_v6 = vperm.slane %v807_v2, 0 }
 0x418   :  { %v809_v9 = vsub.f32 %v795_v3, %v808_v4  ;;  %v811_v7 = vmul.f32 %v810_v6, %v749_v11  ;;  %v812_v5 = vmul.f32 %v810_v6, %v751_v12  ;;  %v813_v10 = vmul.f32 %v810_v6, %v754_v13 }
 0x419   :  { %v814_v14 = vmul.f32 %v810_v6, %v756_v30 }
 0x41a   :  { %v815_v16 = vperm.slane %v809_v9, 0 }
 0x41c   :  { %v816_v22 = vadd.f32 %v815_v16, %v811_v7  ;;  %v817_v23 = vadd.f32 %v815_v16, %v812_v5  ;;  %v818_v18 = vadd.f32 %v815_v16, %v813_v10  ;;  %v819_v17 = vadd.f32 %v815_v16, %v814_v14 }
 0x41e   :  { %v820_v24 = vadd.f32 %v816_v22, %v1855_v35  ;;  %v821_v27 = vadd.f32 %v817_v23, %v1857_v39  ;;  %v822_v28 = vadd.f32 %v818_v18, %v1859_v40  ;;  %v823_v26 = vadd.f32 %v819_v17, %v1861_v41 }
 0x420   :  { %v2030_v25 = vmax.f32 %v820_v24, 0.0  ;;  %v2032_v29 = vmax.f32 %v821_v27, 0.0  ;;  %v2034_v11 = vmax.f32 %v822_v28, 0.0  ;;  %v2036_v12 = vmax.f32 %v823_v26, 0.0 }
 0x422   :  { %v841_v13 = vpack.c.bf16 %v2030_v25, %v2030_v25  ;;  %v842_v35 = vpack.c.bf16 %v2032_v29, %v2032_v29  ;;  %v843_v39 = vpack.c.bf16 %v2034_v11, %v2034_v11  ;;  %v844_v40 = vpack.c.bf16 %v2036_v12, %v2036_v12 }
 0x424   :  { %v846_v41 = vshrl.u32 %v841_v13, 16  ;;  %v854_v30 = vshrl.u32 %v842_v35, 16  ;;  %v863_v31 = vshrl.u32 %v843_v39, 16  ;;  %v871_v32 = vshrl.u32 %v844_v40, 16 }
 0x425   :  { %v849_v42 = vshll.u32 %v841_v13, 16  ;;  %v857_v37 = vshll.u32 %v842_v35, 16  ;;  %v866_v43 = vshll.u32 %v843_v39, 16  ;;  %v874_v20 = vshll.u32 %v844_v40, 16 }
 0x426   :  { %v848_v33 = vrot.slane %v846_v41, 7  ;;  %v856_v36 = vrot.slane %v854_v30, 7  ;;  %v865_v38 = vrot.slane %v863_v31, 7  ;;  %v873_v19 = vrot.slane %v871_v32, 7 }
 0x428   :  { %v851_v21 = vor.u32 %v849_v42, %v848_v33  ;;  %v852_v34 = vrot.slane %v848_v33, 4  ;;  %v859_v44 = vor.u32 %v857_v37, %v856_v36  ;;  %v861_v45 = vrot.slane %v856_v36, 4  ;;  %v1554_v37 = vld [vmem:[%s2206_s2 + $0x88] sm:$0xff] }
 0x429   :  { %v868_v46 = vor.u32 %v866_v43, %v865_v38  ;;  %v869_v47 = vrot.slane %v865_v38, 4  ;;  %v876_v1 = vor.u32 %v874_v20, %v873_v19  ;;  %v878_v48 = vrot.slane %v873_v19, 4  ;;  %1014 = vmatpush.bf16.msra.mxu3 %v1554_v37  ;;  %v1553_v38 = vld [vmem:[%s2206_s2 + $0x80] sm:$0xff]  ;;  %v1552_v43 = vld [vmem:[%s2206_s2 + $0x78] sm:$0xff]  ;;  %v1551_v19 = vld [vmem:[%s2206_s2 + $0x70] sm:$0xff] }
 0x42a   :  { %v860_v49 = vsel %vm1764_vm5, %v852_v34, %v859_v44  ;;  %v885_v50 = vsel %vm1876_vm6, %v851_v21, %v1969_v15  ;;  %v889_v59 = vsel %vm1882_vm7, %v861_v45, %v888_v56  ;;  %v1550_v20 = vld [vmem:[%s2206_s2 + $0x68] sm:$0xff]  ;;  %v1549_v21 = vld [vmem:[%s2206_s2 + $0x60] sm:$0xff] }
 0x42b   :  { %v877_v53 = vsel %vm1764_vm5, %v869_v47, %v876_v1  ;;  %886 = vst [vmem:[#allocation3] sm:$0xf] %v885_v50  ;;  %v892_v54 = vsel %vm1876_vm6, %v868_v46, %v891_v51  ;;  %v896_v57 = vsel %vm1882_vm7, %v878_v48, %v895_v55 }
 0x42c   :  { %887 = vst.msk [vmem:[#allocation3 + $0x4] sm:$0xf] %vm30_vm13, %v860_v49 }
 0x42d   :  { %893 = vst [vmem:[#allocation3 + $0xc] sm:$0xf] %v892_v54  ;;  %1015 = vmatpush.bf16.msra.mxu3 %v1553_v38 }
 0x42e   :  { %894 = vst.msk [vmem:[#allocation3 + $0x10] sm:$0xf] %vm30_vm13, %v877_v53 }
 0x42f   :  { %897 = vst [vmem:[#allocation3 + $0x14] sm:$0x1] %v896_v57 }
 0x430   :  { %890 = vst [vmem:[#allocation3 + $0x8] sm:$0x1] %v889_v59 }
 0x431   :  { %1016 = vmatpush.bf16.msra.mxu3 %v1552_v43 }
 0x432   :  { %v2061_v15 = vld [vmem:[#allocation3] sm:$0xf] }
 0x433   :  { %v899_v60 = vld [vmem:[#allocation3 + $0x4] sm:$0xf]  ;;  %v904_v61 = vunpack.c.l.bf16 %v2061_v15 }
 0x434   :  { %v905_v62 = vunpack.c.l.bf16 %v899_v60 }
 0x435   :  { %v901_v63 = vld [vmem:[#allocation3 + $0xc] sm:$0xff]   ;;  %v938_v0 = vrot.slane %v904_v61, 2  ;;  %v916_v2 = vrot.slane %v904_v61, 1  ;;  %1017 = vmatpush.bf16.msra.mxu3 %v1551_v19 }
 0x436   :  { %v903_v3 = vld [vmem:[#allocation3 + $0x14] sm:$0x1]  ;;  %v2064_v4 = vunpack.c.l.bf16 %v901_v63  ;;  %v908_v6 = vunpack.c.h.bf16 %v901_v63  ;;  %v939_v9 = vrot.slane %v905_v62, 2  ;;  %v917_v7 = vrot.slane %v905_v62, 1 }
 0x437   :  { %v909_v5 = vunpack.c.l.bf16 %v903_v3  ;;  %v900_v10 = vld [vmem:[#allocation3 + $0x8] sm:$0x1] }
 0x438   :  { %v921_v14 = vrot.slane %v2064_v4, 1  ;;  %v922_v16 = vrot.slane %v908_v6, 1  ;;  %v906_v22 = vunpack.c.l.bf16 %v900_v10  ;;  %v940_v18 = vsel %vm147_vm9, %v938_v0, %v939_v9 }
 0x439   :  { %v924_v23 = vrot.slane %v909_v5, 1  ;;  %v918_v27 = vsel %vm124_vm8, %v916_v2, %v917_v7  ;;  %v943_v30 = vrot.slane %v2064_v4, 2  ;;  %v944_v31 = vrot.slane %v908_v6, 2  ;;  %1018 = vmatpush.bf16.msra.mxu3 %v1550_v20 }
 0x43a   :  { %v923_v17 = vsel %vm124_vm8, %v921_v14, %v922_v16  ;;  %v941_v24 = vrot.slane %v906_v22, 2  ;;  %v919_v28 = vrot.slane %v906_v22, 1  ;;  %v946_v32 = vrot.slane %v909_v5, 2 }
 0x43b   :  { %v925_v26 = vsel %vm124_vm8, %v922_v16, %v924_v23  ;;  %v945_v33 = vsel %vm147_vm9, %v943_v30, %v944_v31 }
 0x43c   :  { %v1646_v13 = vpack.i.bf16 %v925_v26, %v923_v17  ;;  %v942_v35 = vsel %vm147_vm9, %v939_v9, %v941_v24  ;;  %v920_v39 = vsel %vm124_vm8, %v917_v7, %v919_v28  ;;  %v947_v42 = vsel %vm147_vm9, %v944_v31, %v946_v32 }
 0x43d   :  { %v1641_v40 = vpack.i.bf16 %v942_v35, %v940_v18  ;;  %v1636_v41 = vpack.i.bf16 %v920_v39, %v918_v27  ;;  %v1651_v36 = vpack.i.bf16 %v947_v42, %v945_v33  ;;  %1019 = vmatpush.bf16.msra.mxu3 %v1549_v21 }
 0x43e   :  { %1647 = vrot.lane.b32.xlu2 %v1646_v13, %s1715_s15 }
 0x43f   :  { %1642 = vrot.lane.b32.xlu1 %v1641_v40, %s1716_s16  ;;  %1637 = vrot.lane.b32.xlu0 %v1636_v41, %s1715_s15 }
 0x447   :  { %1652 = vrot.lane.b32.xlu0 %v1651_v36, %s1716_s16 }
 0x498   :  { %v1648_v54 = vpop.permute.xlu2 %1647 }
 0x499   :  { %v1650_v56 = vunpack.i.h.bf16 %v1648_v54  ;;  %v1649_v57 = vunpack.i.l.bf16 %v1648_v54  ;;  %v1066_v54 = vld [vmem:[%s2207_s3 + $0x3] sm:$0x1] }
 0x49b   :  { %v963_v63 = vsel %vm216_vm15, %v908_v6, %v1650_v56 }
 0x4b1   :  { %v1643_v34 = vpop.permute.xlu1 %1642  ;;  %v1638_v44 = vpop.permute.xlu0 %1637 }
 0x4b2   :  { %v1645_v45 = vunpack.i.h.bf16 %v1643_v34  ;;  %v1644_v46 = vunpack.i.l.bf16 %v1643_v34  ;;  %v1640_v47 = vunpack.i.h.bf16 %v1638_v44  ;;  %v1639_v1 = vunpack.i.l.bf16 %v1638_v44 }
 0x4b4   :  { %v961_v48 = vsel %vm216_vm15, %v905_v62, %v1640_v47  ;;  %v960_v49 = vsel %vm216_vm15, %v904_v61, %v1639_v1  ;;  %v962_v62 = vsel %vm216_vm15, %v2064_v4, %v1649_v57 }
 0x4b5   :  { %v964_v50 = vsel %vm422_vm2, %v960_v49, %v1644_v46  ;;  %v965_v51 = vsel %vm422_vm2, %v961_v48, %v1645_v45 }
 0x4b6   :  { %v968_v53 = vpack.c.bf16 %v965_v51, %v964_v50 }
 0x4b8   :  { %1496 = vmatmul.msk.bf16.vlgmr.msra.gmra.mxu3 %vm465_vm4, %v968_v53 }
 0x4b9   :  { %v1653_v55 = vpop.permute.xlu0 %1652 }
 0x4ba   :  { %v1655_v59 = vunpack.i.h.bf16 %v1653_v55  ;;  %v1654_v60 = vunpack.i.l.bf16 %v1653_v55 }
 0x4bc   :  { %v966_v61 = vsel %vm422_vm2, %v962_v62, %v1654_v60  ;;  %v967_v0 = vsel %vm422_vm2, %v963_v63, %v1655_v59  ;;  %v1067_v59 = vld [vmem:[%s2208_s4 + $0x3] sm:$0x1] }
 0x4bd   :  { %v969_v2 = vpack.c.bf16 %v967_v0, %v966_v61 }
 0x4c8   :  { %1497 = vmatmul.msk.bf16.gmra.mxu3 %vm465_vm4, %v969_v2 }
 0x53b   :  { %v1021_v3 = vpop.f32.mrf.mxu3 }
 0x53c   :  { %v1044_v10 = vmul.f32 %v1021_v3, %v1021_v3  ;;  %v1031_v6 = vsel %vm216_vm15, %v1021_v3, 0.0 }
 0x53e   :  { %v1048_v18 = vsel %vm216_vm15, %v1044_v10, 0.0 }
 0x543   :  { %v1023_v9 = vpop.f32.mrf.mxu3 }
 0x544   :  { %v1045_v5 = vmul.f32 %v1023_v9, %v1023_v9  ;;  %v1032_v14 = vsel %vm216_vm15, %v1023_v9, 0.0 }
 0x545   :  { %v1033_v23 = vadd.f32 %v1032_v14, %v1031_v6 }
 0x546   :  { %v1049_v22 = vsel %vm216_vm15, %v1045_v5, 0.0 }
 0x547   :  { %v1050_v24 = vadd.f32 %v1049_v22, %v1048_v18 }
 0x54b   :  { %v1026_v7 = vpop.f32.mrf.mxu3 }
 0x54c   :  { %v1046_v16 = vmul.f32 %v1026_v7, %v1026_v7  ;;  %v1034_v4 = vsel %vm216_vm15, %v1026_v7, 0.0 }
 0x54d   :  { %v1035_v27 = vadd.f32 %v1034_v4, %v1033_v23 }
 0x54e   :  { %v1051_v17 = vsel %vm216_vm15, %v1046_v16, 0.0 }
 0x54f   :  { %v1052_v35 = vadd.f32 %v1051_v17, %v1050_v24 }
 0x553   :  { %v1028_v28 = vpop.f32.mrf.mxu3 }
 0x554   :  { %v1036_v26 = vsel %vm216_vm15, %v1028_v28, 0.0  ;;  %v1047_v13 = vmul.f32 %v1028_v28, %v1028_v28 }
 0x555   :  { %v1037_v39 = vadd.f32 %v1036_v26, %v1035_v27 }
 0x556   :  { %v1053_v40 = vsel %vm216_vm15, %v1047_v13, 0.0 }
 0x557   :  { %v1038_v41 = vrot.slane %v1037_v39, 4  ;;  %v1054_v30 = vadd.f32 %v1053_v40, %v1052_v35 }
 0x559   :  { %v1039_v31 = vadd.f32 %v1038_v41, %v1037_v39  ;;  %v1055_v32 = vrot.slane %v1054_v30, 4 }
 0x55b   :  { %v1040_v33 = vrot.slane %v1039_v31, 2  ;;  %v1056_v42 = vadd.f32 %v1055_v32, %v1054_v30  ;;  %v1560_v30 = vld [vmem:[%s2206_s2 + $0xb8] sm:$0xff] }
 0x55c   :  { %1282 = vmatpush.bf16.msrb.mxu0 %v1560_v30  ;;  %v1555_v30 = vld [vmem:[%s2206_s2 + $0x90] sm:$0xff] }
 0x55d   :  { %v1041_v36 = vadd.f32 %v1040_v33, %v1039_v31  ;;  %v1057_v37 = vrot.slane %v1056_v42, 2 }
 0x55f   :  { %v1042_v38 = vrot.slane %v1041_v36, 1  ;;  %v1058_v43 = vadd.f32 %v1057_v37, %v1056_v42 }
 0x561   :  { %v1043_v19 = vadd.f32 %v1042_v38, %v1041_v36  ;;  %v1059_v20 = vrot.slane %v1058_v43, 1 }
 0x563   :  { %v1060_v21 = vadd.f32 %v1059_v20, %v1058_v43  ;;  %v1061_v34 = vmul.f32 0.03125, %v1043_v19 }
 0x565   :  { %v1062_v44 = vmul.f32 0.03125, %v1060_v21  ;;  %v1063_v45 = vmul.f32 %v1061_v34, %v1061_v34 }
 0x567   :  { %v1064_v46 = vsub.f32 %v1062_v44, %v1063_v45 }
 0x569   :  { %v1065_v47 = vmax.f32 %v1064_v46, 0.0  ;;  %v1163_v46 = vld [vmem:[#allocation3 + $0x14] sm:$0x1] }
 0x56b   :  { %v1068_v1 = vadd.f32 1e-05, %v1065_v47 }
 0x56d   :  { %1682 = vrsqrt.f32 %v1068_v1  ;;  %vm1075_vm10 = vweird.f32 %v1068_v1 }
 0x573   :  { %v1683_v48 = vpop.eup %1682 }
 0x574   :  { %v1070_v49 = vmul.f32 %v1683_v48, %v1068_v1  ;;  %vm1076_vm3 = vweird.f32 %v1683_v48  ;;  %v1156_v1 = vld [vmem:[#allocation3 + $0x8] sm:$0x1] }
 0x575   :  { %vm1077_vm11 = vmor %vm1075_vm10, %vm1076_vm3 }
 0x576   :  { %v1071_v50 = vmul.f32 %v1683_v48, %v1070_v49 }
 0x578   :  { %v1072_v51 = vmul.f32 0.5, %v1071_v50  ;;  %v1159_v50 = vld [vmem:[#allocation3 + $0xc] sm:$0xf] }
 0x57a   :  { %v1073_v53 = vsub.f32 1.5, %v1072_v51 }
 0x57c   :  { %v1074_v55 = vmul.f32 %v1683_v48, %v1073_v53 }
 0x57e   :  { %v1078_v56 = vsel %vm1077_vm11, %v1683_v48, %v1074_v55 }
 0x57f   :  { %v1079_v57 = vmul.f32 %v1078_v56, %v1066_v54 }
 0x581   :  { %v1080_v60 = vmul.f32 %v1079_v57, %v1061_v34  ;;  %v1082_v63 = vperm.slane %v1079_v57, 0 }
 0x583   :  { %v1081_v62 = vsub.f32 %v1067_v59, %v1080_v60  ;;  %v1083_v61 = vmul.f32 %v1082_v63, %v1021_v3  ;;  %v1084_v0 = vmul.f32 %v1082_v63, %v1023_v9  ;;  %v1085_v2 = vmul.f32 %v1082_v63, %v1026_v7 }
 0x584   :  { %v1086_v5 = vmul.f32 %v1082_v63, %v1028_v28 }
 0x585   :  { %v1087_v10 = vperm.slane %v1081_v62, 0 }
 0x587   :  { %v1088_v14 = vadd.f32 %v1087_v10, %v1083_v61  ;;  %v1089_v16 = vadd.f32 %v1087_v10, %v1084_v0  ;;  %v1090_v6 = vadd.f32 %v1087_v10, %v1085_v2  ;;  %v1091_v22 = vadd.f32 %v1087_v10, %v1086_v5 }
 0x589   :  { %v1092_v4 = vmax.f32 %v1088_v14, 0.0  ;;  %v1093_v23 = vmax.f32 %v1089_v16, 0.0  ;;  %v1094_v18 = vmax.f32 %v1090_v6, 0.0  ;;  %v1095_v17 = vmax.f32 %v1091_v22, 0.0 }
 0x58b   :  { %v1109_v24 = vpack.c.bf16 %v1092_v4, %v1092_v4  ;;  %v1110_v27 = vpack.c.bf16 %v1093_v23, %v1093_v23  ;;  %v1111_v26 = vpack.c.bf16 %v1094_v18, %v1094_v18  ;;  %v1112_v13 = vpack.c.bf16 %v1095_v17, %v1095_v17 }
 0x58d   :  { %v1114_v35 = vshrl.u32 %v1109_v24, 16  ;;  %v1122_v39 = vshrl.u32 %v1110_v27, 16  ;;  %v1131_v40 = vshrl.u32 %v1111_v26, 16  ;;  %v1139_v3 = vshrl.u32 %v1112_v13, 16 }
 0x58e   :  { %v1117_v7 = vshll.u32 %v1109_v24, 16  ;;  %v1125_v41 = vshll.u32 %v1110_v27, 16  ;;  %v1134_v32 = vshll.u32 %v1111_v26, 16  ;;  %v1142_v42 = vshll.u32 %v1112_v13, 16 }
 0x58f   :  { %v1116_v9 = vrot.slane %v1114_v35, 7  ;;  %v1124_v28 = vrot.slane %v1122_v39, 7  ;;  %v1133_v31 = vrot.slane %v1131_v40, 7  ;;  %v1141_v33 = vrot.slane %v1139_v3, 7 }
 0x591   :  { %v1119_v36 = vor.u32 %v1117_v7, %v1116_v9  ;;  %v1120_v37 = vrot.slane %v1116_v9, 4  ;;  %v1127_v38 = vor.u32 %v1125_v41, %v1124_v28  ;;  %v1129_v43 = vrot.slane %v1124_v28, 4  ;;  %v1559_v9 = vld [vmem:[%s2206_s2 + $0xb0] sm:$0xff]  ;;  %v1558_v7 = vld [vmem:[%s2206_s2 + $0xa8] sm:$0xff]  ;;  %v1557_v28 = vld [vmem:[%s2206_s2 + $0xa0] sm:$0xff] }
 0x592   :  { %v1136_v19 = vor.u32 %v1134_v32, %v1133_v31  ;;  %v1137_v20 = vrot.slane %v1133_v31, 4  ;;  %v1144_v21 = vor.u32 %v1142_v42, %v1141_v33  ;;  %v1146_v34 = vrot.slane %v1141_v33, 4  ;;  %1283 = vmatpush.bf16.msrb.mxu0 %v1559_v9  ;;  %v1556_v41 = vld [vmem:[%s2206_s2 + $0x98] sm:$0xff] }
 0x593   :  { %v1128_v44 = vsel %vm1764_vm5, %v1120_v37, %v1127_v38  ;;  %v1153_v45 = vsel %vm1876_vm6, %v1119_v36, %v2061_v15  ;;  %v1157_v49 = vsel %vm1882_vm7, %v1129_v43, %v1156_v1 }
 0x594   :  { %v1145_v47 = vsel %vm1764_vm5, %v1137_v20, %v1144_v21  ;;  %1154 = vst [vmem:[#allocation3] sm:$0xf] %v1153_v45  ;;  %v1164_v48 = vsel %vm1882_vm7, %v1146_v34, %v1163_v46  ;;  %v1160_v51 = vsel %vm1876_vm6, %v1136_v19, %v1159_v50 }
 0x595   :  { %1155 = vst.msk [vmem:[#allocation3 + $0x4] sm:$0xf] %vm30_vm13, %v1128_v44 }
 0x596   :  { %1162 = vst.msk [vmem:[#allocation3 + $0x10] sm:$0xf] %vm30_vm13, %v1145_v47  ;;  %1284 = vmatpush.bf16.msrb.mxu0 %v1558_v7 }
 0x597   :  { %1165 = vst [vmem:[#allocation3 + $0x14] sm:$0x1] %v1164_v48 }
 0x598   :  { %1158 = vst [vmem:[#allocation3 + $0x8] sm:$0x1] %v1157_v49 }
 0x599   :  { %1161 = vst [vmem:[#allocation3 + $0xc] sm:$0xf] %v1160_v51 }
 0x59a   :  { %1285 = vmatpush.bf16.msrb.mxu0 %v1557_v28 }
 0x59c   :  { %v1566_v8 = vld [vmem:[#allocation3] sm:$0xff]  }
 0x59d   :  { %v1567_v15 = vunpack.c.l.bf16 %v1566_v8  ;;  %v1568_v53 = vunpack.c.h.bf16 %v1566_v8 }
 0x59e   :  { %v1171_v54 = vld [vmem:[#allocation3 + $0x14] sm:$0x1]  ;;  %1286 = vmatpush.bf16.msrb.mxu0 %v1556_v41 }
 0x59f   :  { %v1177_v55 = vunpack.c.l.bf16 %v1171_v54  ;;  %v1168_v56 = vld [vmem:[#allocation3 + $0x8] sm:$0x1]  ;;  %v1206_v57 = vrot.slane %v1567_v15, 2  ;;  %v1207_v59 = vrot.slane %v1568_v53, 2  ;;  %v1184_v60 = vrot.slane %v1567_v15, 1 }
 0x5a0   :  { %v1169_v58 = vld [vmem:[#allocation3 + $0xc] sm:$0xff]   ;;  %v1174_v63 = vunpack.c.l.bf16 %v1168_v56  ;;  %v1185_v62 = vrot.slane %v1568_v53, 1 }
 0x5a1   :  { %v1175_v61 = vunpack.c.l.bf16 %v1169_v58  ;;  %v1176_v52 = vunpack.c.h.bf16 %v1169_v58  ;;  %v1192_v0 = vrot.slane %v1177_v55, 1  ;;  %v1208_v2 = vsel %vm147_vm9, %v1206_v57, %v1207_v59 }
 0x5a2   :  { %v1209_v5 = vrot.slane %v1174_v63, 2  ;;  %v1186_v10 = vsel %vm124_vm8, %v1184_v60, %v1185_v62  ;;  %v1187_v14 = vrot.slane %v1174_v63, 1  ;;  %v1214_v35 = vrot.slane %v1177_v55, 2  ;;  %1287 = vmatpush.bf16.msrb.mxu0 %v1555_v30 }
 0x5a3   :  { %v1189_v16 = vrot.slane %v1175_v61, 1  ;;  %v1190_v6 = vrot.slane %v1176_v52, 1  ;;  %v1211_v26 = vrot.slane %v1175_v61, 2  ;;  %v1212_v13 = vrot.slane %v1176_v52, 2 }
 0x5a4   :  { %v1210_v22 = vsel %vm147_vm9, %v1207_v59, %v1209_v5  ;;  %v1188_v4 = vsel %vm124_vm8, %v1185_v62, %v1187_v14 }
 0x5a5   :  { %v1191_v23 = vsel %vm124_vm8, %v1189_v16, %v1190_v6  ;;  %v1193_v18 = vsel %vm124_vm8, %v1190_v6, %v1192_v0  ;;  %v1661_v17 = vpack.i.bf16 %v1210_v22, %v1208_v2  ;;  %v1656_v24 = vpack.i.bf16 %v1188_v4, %v1186_v10 }
 0x5a6   :  { %v1666_v27 = vpack.i.bf16 %v1193_v18, %v1191_v23  ;;  %v1213_v39 = vsel %vm147_vm9, %v1211_v26, %v1212_v13  ;;  %v1215_v40 = vsel %vm147_vm9, %v1212_v13, %v1214_v35 }
 0x5a7   :  { %1662 = vrot.lane.b32.xlu2 %v1661_v17, %s1716_s16  ;;  %1657 = vrot.lane.b32.xlu1 %v1656_v24, %s1715_s15  ;;  %v1671_v3 = vpack.i.bf16 %v1215_v40, %v1213_v39 }
 0x5a8   :  { %1667 = vrot.lane.b32.xlu0 %v1666_v27, %s1715_s15 }
 0x5af   :  { %1672 = vrot.lane.b32.xlu1 %v1671_v3, %s1716_s16 }
 0x601   :  { %v1663_v31 = vpop.permute.xlu2 %1662 }
 0x602   :  { %v1665_v36 = vunpack.i.h.bf16 %v1663_v31  ;;  %v1664_v37 = vunpack.i.l.bf16 %v1663_v31 }
 0x619   :  { %v1658_v32 = vpop.permute.xlu1 %1657 }
 0x61a   :  { %v1660_v33 = vunpack.i.h.bf16 %v1658_v32  ;;  %v1659_v42 = vunpack.i.l.bf16 %v1658_v32  ;;  %v1668_v34 = vpop.permute.xlu0 %1667 }
 0x61b   :  { %v1670_v45 = vunpack.i.h.bf16 %v1668_v34  ;;  %v1669_v46 = vunpack.i.l.bf16 %v1668_v34  ;;  %v1335_v34 = vld [vmem:[%s2208_s4 + $0x4] sm:$0x1] }
 0x61c   :  { %v1229_v38 = vsel %vm216_vm15, %v1568_v53, %v1660_v33  ;;  %v1228_v43 = vsel %vm216_vm15, %v1567_v15, %v1659_v42 }
 0x61d   :  { %v1232_v19 = vsel %vm422_vm2, %v1228_v43, %v1664_v37  ;;  %v1233_v20 = vsel %vm422_vm2, %v1229_v38, %v1665_v36  ;;  %v1231_v48 = vsel %vm216_vm15, %v1176_v52, %v1670_v45  ;;  %v1230_v49 = vsel %vm216_vm15, %v1175_v61, %v1669_v46  ;;  %v1334_v43 = vld [vmem:[%s2207_s3 + $0x4] sm:$0x1]  ;;  %s1717_s3 = smov [#allocation4]  }
 0x61e   :  { %v1236_v21 = vpack.c.bf16 %v1233_v20, %v1232_v19  ;;  %s1376_s4 = sshll.u32 %s1717_s3, 4  ;;  %s1377_s4 = int_to_ptr.vmem [resolvable:$true] %s1376_s4 }
 0x620   :  { %1534 = vmatmul.msk.bf16.vlgmr.msrb.gmra.mxu0 %vm465_vm4, %v1236_v21 }
 0x621   :  { %v1673_v44 = vpop.permute.xlu1 %1672 }
 0x622   :  { %v1675_v47 = vunpack.i.h.bf16 %v1673_v44  ;;  %v1674_v1 = vunpack.i.l.bf16 %v1673_v44 }
 0x624   :  { %v1234_v50 = vsel %vm422_vm2, %v1230_v49, %v1674_v1  ;;  %v1235_v51 = vsel %vm422_vm2, %v1231_v48, %v1675_v47 }
 0x625   :  { %v1237_v8 = vpack.c.bf16 %v1235_v51, %v1234_v50 }
 0x630   :  { %1535 = vmatmul.msk.bf16.gmra.mxu0 %vm465_vm4, %v1237_v8 }
 0x69d   :  { %v1289_v15 = vpop.f32.mrf.mxu0 }
 0x69e   :  { %v1312_v56 = vmul.f32 %v1289_v15, %v1289_v15  ;;  %v1299_v60 = vsel %vm216_vm15, %v1289_v15, 0.0 }
 0x6a0   :  { %v1316_v61 = vsel %vm216_vm15, %v1312_v56, 0.0 }
 0x6a5   :  { %v1291_v53 = vpop.f32.mrf.mxu0 }
 0x6a6   :  { %v1313_v55 = vmul.f32 %v1291_v53, %v1291_v53  ;;  %v1300_v57 = vsel %vm216_vm15, %v1291_v53, 0.0 }
 0x6a7   :  { %v1301_v62 = vadd.f32 %v1300_v57, %v1299_v60 }
 0x6a8   :  { %v1317_v58 = vsel %vm216_vm15, %v1313_v55, 0.0 }
 0x6a9   :  { %v1318_v0 = vadd.f32 %v1317_v58, %v1316_v61 }
 0x6ad   :  { %v1294_v54 = vpop.f32.mrf.mxu0 }
 0x6ae   :  { %v1314_v59 = vmul.f32 %v1294_v54, %v1294_v54  ;;  %v1302_v63 = vsel %vm216_vm15, %v1294_v54, 0.0 }
 0x6af   :  { %v1303_v2 = vadd.f32 %v1302_v63, %v1301_v62 }
 0x6b0   :  { %v1319_v52 = vsel %vm216_vm15, %v1314_v59, 0.0 }
 0x6b1   :  { %v1320_v16 = vadd.f32 %v1319_v52, %v1318_v0 }
 0x6b5   :  { %v1296_v5 = vpop.f32.mrf.mxu0 }
 0x6b6   :  { %v1304_v10 = vsel %vm216_vm15, %v1296_v5, 0.0  ;;  %v1315_v14 = vmul.f32 %v1296_v5, %v1296_v5 }
 0x6b7   :  { %v1305_v6 = vadd.f32 %v1304_v10, %v1303_v2 }
 0x6b8   :  { %v1321_v22 = vsel %vm216_vm15, %v1315_v14, 0.0 }
 0x6b9   :  { %v1306_v4 = vrot.slane %v1305_v6, 4  ;;  %v1322_v23 = vadd.f32 %v1321_v22, %v1320_v16 }
 0x6bb   :  { %v1307_v18 = vadd.f32 %v1306_v4, %v1305_v6  ;;  %v1323_v17 = vrot.slane %v1322_v23, 4 }
 0x6bd   :  { %v1308_v24 = vrot.slane %v1307_v18, 2  ;;  %v1324_v27 = vadd.f32 %v1323_v17, %v1322_v23 }
 0x6bf   :  { %v1309_v26 = vadd.f32 %v1308_v24, %v1307_v18  ;;  %v1325_v13 = vrot.slane %v1324_v27, 2 }
 0x6c1   :  { %v1310_v35 = vrot.slane %v1309_v26, 1  ;;  %v1326_v39 = vadd.f32 %v1325_v13, %v1324_v27 }
 0x6c3   :  { %v1311_v40 = vadd.f32 %v1310_v35, %v1309_v26  ;;  %v1327_v3 = vrot.slane %v1326_v39, 1 }
 0x6c5   :  { %v1328_v9 = vadd.f32 %v1327_v3, %v1326_v39  ;;  %v1329_v7 = vmul.f32 0.03125, %v1311_v40 }
 0x6c7   :  { %v1330_v28 = vmul.f32 0.03125, %v1328_v9  ;;  %v1331_v41 = vmul.f32 %v1329_v7, %v1329_v7 }
 0x6c9   :  { %v1332_v30 = vsub.f32 %v1330_v28, %v1331_v41 }
 0x6cb   :  { %v1333_v31 = vmax.f32 %v1332_v30, 0.0 }
 0x6cd   :  { %v1336_v32 = vadd.f32 1e-05, %v1333_v31 }
 0x6cf   :  { %1684 = vrsqrt.f32 %v1336_v32  ;;  %vm1343_vm8 = vweird.f32 %v1336_v32 }
 0x6d5   :  { %v1685_v33 = vpop.eup %1684 }
 0x6d6   :  { %v1338_v42 = vmul.f32 %v1685_v33, %v1336_v32  ;;  %vm1344_vm5 = vweird.f32 %v1685_v33 }
 0x6d7   :  { %vm1345_vm9 = vmor %vm1343_vm8, %vm1344_vm5 }
 0x6d8   :  { %v1339_v36 = vmul.f32 %v1685_v33, %v1338_v42 }
 0x6da   :  { %v1340_v37 = vmul.f32 0.5, %v1339_v36 }
 0x6dc   :  { %v1341_v38 = vsub.f32 1.5, %v1340_v37 }
 0x6de   :  { %v1342_v19 = vmul.f32 %v1685_v33, %v1341_v38 }
 0x6e0   :  { %v1346_v20 = vsel %vm1345_vm9, %v1685_v33, %v1342_v19 }
 0x6e1   :  { %v1347_v21 = vmul.f32 %v1346_v20, %v1334_v43 }
 0x6e3   :  { %v1348_v44 = vmul.f32 %v1347_v21, %v1329_v7  ;;  %v1350_v45 = vperm.slane %v1347_v21, 0 }
 0x6e5   :  { %v1349_v46 = vsub.f32 %v1335_v34, %v1348_v44  ;;  %v1351_v47 = vmul.f32 %v1350_v45, %v1289_v15  ;;  %v1352_v1 = vmul.f32 %v1350_v45, %v1291_v53  ;;  %v1353_v48 = vmul.f32 %v1350_v45, %v1294_v54 }
 0x6e6   :  { %v1354_v49 = vmul.f32 %v1350_v45, %v1296_v5 }
 0x6e7   :  { %v1355_v50 = vperm.slane %v1349_v46, 0 }
 0x6e9   :  { %v1356_v51 = vadd.f32 %v1355_v50, %v1351_v47  ;;  %v1357_v8 = vadd.f32 %v1355_v50, %v1352_v1  ;;  %v1358_v55 = vadd.f32 %v1355_v50, %v1353_v48  ;;  %v1359_v56 = vadd.f32 %v1355_v50, %v1354_v49 }
 0x6eb   :  { %v1360_v57 = vadd.f32 %v1356_v51, %v2030_v25  ;;  %v1361_v59 = vadd.f32 %v1357_v8, %v2032_v29  ;;  %v1362_v60 = vadd.f32 %v1358_v55, %v2034_v11  ;;  %v1363_v58 = vadd.f32 %v1359_v56, %v2036_v12 }
 0x6ed   :  { %v1367_v63 = vmax.f32 %v1363_v58, 0.0  ;;  %v1364_v15 = vmax.f32 %v1360_v57, 0.0  ;;  %v1365_v53 = vmax.f32 %v1361_v59, 0.0  ;;  %v1366_v54 = vmax.f32 %v1362_v60, 0.0 }
 0x6ef   :  { %1371 = vst.msk [vmem:[#allocation4 + $0x18] sm:$0xff] %vm216_vm15, %v1367_v63 }
 0x6f0   :  { %1368 = vst.msk [vmem:[#allocation4] sm:$0xff] %vm216_vm15, %v1364_v15 }
 0x6f1   :  { %1369 = vst.msk [vmem:[#allocation4 + $0x8] sm:$0xff] %vm216_vm15, %v1365_v53 }
 0x6f2   :  { %1370 = vst.msk [vmem:[#allocation4 + $0x10] sm:$0xff] %vm216_vm15, %v1366_v54 }
 0x6f3   :  { %1384 = dma.vmem_to_hbm [thread:$0]  %s1377_s4, 512, %s1379_s0, [#allocation5], %s1718_s27, %s1718_s27, %s1714_s26  }
 0x6f4   :  { %1710 = dma.done.wait [#allocation5], 512  }
 0x6f5   :  { %1711 = vsyncadd [#allocation5], 4294966784 }
 0x6f6   :  { %1389 = vsyncpa [#allocation5], 1 }

</bundles_post_ra>
